<compile_context>
chip_gen: v5e
topology: v5e:2x2
jax: 0.10.0
libtpu: 0.0.40
codegen_flags: <defaults>
</compile_context>

<pallas_src>
import jax
import jax.numpy as jnp
from jax.experimental import pallas as pl
from jax.experimental.pallas import tpu as pltpu

IN_FEATURES = 1024
HIDDEN = 512
OUT_FEATURES = 80
OUT_PAD = 128          # lane-dense padded output width (80 -> 128)
MAX_TB = 1024          # max batch-tile rows


def _cdiv(a, b):
    return (a + b - 1) // b


def _round_up(x, m):
    return ((x + m - 1) // m) * m


def _choose_batch_tile(B):
    """Balanced batch tiling: cdiv(B, MAX_TB) tiles, but at least 2 tiles once
    B > 128 so both v7x TensorCores get work.  TB is a multiple of 16 (bf16
    sublane packing)."""
    n_tiles = max(1, _cdiv(B, MAX_TB))
    if n_tiles == 1 and B > 128:
        n_tiles = 2
    tb = _round_up(_cdiv(B, n_tiles), 16)
    n_tiles = _cdiv(B, tb)
    return tb, n_tiles


def mlp_kernel(x_ref, w1_ref, b1_ref, w2_ref, b2_ref, o_ref):
    # x_ref:  (TB, 1024)  f32   (cast to bf16 here; VPU cast hides under MXU)
    # w1_ref: (1024, 512) bf16  (in x out layout)
    # b1_ref: (1, 512)    f32
    # w2_ref: (512, 128)  bf16  (in x out_padded layout, cols >= 80 are zero)
    # b2_ref: (1, 128)    f32   (entries >= 80 are zero)
    # o_ref:  (TB, 128)   f32
    x = x_ref[...].astype(jnp.bfloat16)
    h = jnp.dot(x, w1_ref[...], preferred_element_type=jnp.float32)
    h = jnp.maximum(h + b1_ref[...], 0.0)                 # bias + ReLU in f32
    y = jnp.dot(h.astype(jnp.bfloat16), w2_ref[...],
                preferred_element_type=jnp.float32)
    o_ref[...] = y + b2_ref[...]


def prepare_params(w1, b1, w2, b2):
    """One-time prep: transpose to (in, out), zero-pad fc2 to 128 outputs,
    cast weights to bf16, biases stay f32.  w1: (512, 1024), w2: (80, 512)
    in PyTorch (out, in) convention; b1: (512,), b2: (80,)."""
    w1_t = jnp.asarray(w1, jnp.float32).T.astype(jnp.bfloat16)        # (1024, 512)
    w2_t = jnp.zeros((HIDDEN, OUT_PAD), jnp.bfloat16)
    w2_t = w2_t.at[:, :OUT_FEATURES].set(
        jnp.asarray(w2, jnp.float32).T.astype(jnp.bfloat16))          # (512, 128)
    b1_2d = jnp.asarray(b1, jnp.float32).reshape(1, HIDDEN)
    b2_2d = jnp.zeros((1, OUT_PAD), jnp.float32)
    b2_2d = b2_2d.at[:, :OUT_FEATURES].set(jnp.asarray(b2, jnp.float32))
    return w1_t, b1_2d, w2_t, b2_2d


def net_forward(x, params):
    """x: (B, C, H, W) with C*H*W == 1024. params: output of prepare_params."""
    w1_t, b1_2d, w2_t, b2_2d = params
    B = x.shape[0]
    x_flat = x.reshape(B, -1)                                # x.view(B, -1)
    assert x_flat.shape[1] == IN_FEATURES

    TB, n_tiles = _choose_batch_tile(B)

    cost = pl.CostEstimate(
        flops=2 * n_tiles * TB * (IN_FEATURES * HIDDEN + HIDDEN * OUT_PAD),
        transcendentals=0,
        bytes_accessed=(B * IN_FEATURES * 4                  # x (f32, read once)
                        + IN_FEATURES * HIDDEN * 2           # w1 (bf16)
                        + HIDDEN * OUT_PAD * 2               # w2 (bf16)
                        + HIDDEN * 4 + OUT_PAD * 4           # biases (f32)
                        + B * OUT_PAD * 4),                  # out (f32)
    )

    out_padded = pl.pallas_call(
        mlp_kernel,
        out_shape=jax.ShapeDtypeStruct((B, OUT_PAD), jnp.float32),
        grid=(n_tiles,),
        in_specs=[
            pl.BlockSpec((TB, IN_FEATURES), lambda i: (i, 0)),      # x tile
            pl.BlockSpec((IN_FEATURES, HIDDEN), lambda i: (0, 0)),  # w1 resident
            pl.BlockSpec((1, HIDDEN), lambda i: (0, 0)),            # b1 resident
            pl.BlockSpec((HIDDEN, OUT_PAD), lambda i: (0, 0)),      # w2 resident
            pl.BlockSpec((1, OUT_PAD), lambda i: (0, 0)),           # b2 resident
        ],
        out_specs=pl.BlockSpec((TB, OUT_PAD), lambda i: (i, 0)),
        compiler_params=pltpu.CompilerParams(
            dimension_semantics=("parallel",),
            # TB=1024 uses ~20 MiB incl. double-buffered x/out + scratch;
            # 32 MiB raises v5e's 16 MiB default and is the v6e/v7x default.
            vmem_limit_bytes=32 * 1024 * 1024,
        ),
        cost_estimate=cost,
    )(x_flat, w1_t, b1_2d, w2_t, b2_2d)

    # Output rows are exactly B (partial last tile's OOB rows are masked on
    # writeback); only the padded fc2 columns need slicing away.
    return out_padded[:, :OUT_FEATURES]


def init_params(key):
    """Deterministic init mirroring nn.Linear's U(-1/sqrt(fan_in), 1/sqrt(fan_in)).
    Returns PyTorch-layout (out, in) f32 weights."""
    k1, k2, k3, k4 = jax.random.split(key, 4)
    bound1 = 1.0 / jnp.sqrt(IN_FEATURES)
    bound2 = 1.0 / jnp.sqrt(HIDDEN)
    w1 = jax.random.uniform(k1, (HIDDEN, IN_FEATURES), jnp.float32, -bound1, bound1)
    b1 = jax.random.uniform(k2, (HIDDEN,), jnp.float32, -bound1, bound1)
    w2 = jax.random.uniform(k3, (OUT_FEATURES, HIDDEN), jnp.float32, -bound2, bound2)
    b2 = jax.random.uniform(k4, (OUT_FEATURES,), jnp.float32, -bound2, bound2)
    return w1, b1, w2, b2


if __name__ == "__main__":
    key = jax.random.PRNGKey(0)
    k_params, k_x = jax.random.split(key)

    # B=2, C=4, H=16, W=16  ->  C*H*W = 1024, matching fc1's input dim.
    B, C, H, W = 2, 4, 16, 16
    x = jax.random.normal(k_x, (B, C, H, W), jnp.float32)
    w1, b1, w2, b2 = init_params(k_params)

    params = prepare_params(w1, b1, w2, b2)   # one-time: transpose/pad/cast
    out = net_forward(x, params)
    out = jax.block_until_ready(out)

    # Pure-JAX f32 reference; kernel uses bf16 matmuls w/ f32 accumulation,
    # so tolerances are loosened accordingly.
    x_flat = x.reshape(B, -1)
    ref = jnp.maximum(x_flat @ w1.T + b1, 0.0) @ w2.T + b2
    assert out.shape == (B, OUT_FEATURES)
    assert jnp.allclose(out, ref, atol=5e-2, rtol=5e-2)

    print("KERNEL_OK")
</pallas_src>

<mosaic_0001>
module attributes {stable_mosaic.version = 11 : i64} {
  func.func @mlp_kernel(%arg0: i32, %arg1: memref<16x1024xf32, #tpu.memory_space<vmem>>, %arg2: memref<1024x512xbf16, #tpu.memory_space<vmem>>, %arg3: memref<1x512xf32, #tpu.memory_space<vmem>>, %arg4: memref<512x128xbf16, #tpu.memory_space<vmem>>, %arg5: memref<1x128xf32, #tpu.memory_space<vmem>>, %arg6: memref<16x128xf32, #tpu.memory_space<vmem>>) attributes {dimension_semantics = [#tpu.dimension_semantics<parallel>], iteration_bounds = array<i64: 1>, scalar_prefetch = 0 : i64, scratch_operands = 0 : i64, tpu.core_type = #tpu.core_type<tc>, window_params = [{transform_indices = @transform_0, window_bounds = array<i64: 16, 1024>}, {pipeline_mode = #tpu.pipeline_mode<synchronous>, transform_indices = @transform_1, window_bounds = array<i64: 1024, 512>}, {pipeline_mode = #tpu.pipeline_mode<synchronous>, transform_indices = @transform_2, window_bounds = array<i64: 1, 512>}, {pipeline_mode = #tpu.pipeline_mode<synchronous>, transform_indices = @transform_3, window_bounds = array<i64: 512, 128>}, {pipeline_mode = #tpu.pipeline_mode<synchronous>, transform_indices = @transform_4, window_bounds = array<i64: 1, 128>}, {transform_indices = @transform_5, window_bounds = array<i64: 16, 128>}]} {
    %c0 = arith.constant 0 : index
    %c0_0 = arith.constant 0 : index
    %0 = vector.load %arg1[%c0, %c0_0] : memref<16x1024xf32, #tpu.memory_space<vmem>>, vector<16x1024xf32>
    %1 = arith.truncf %0 : vector<16x1024xf32> to vector<16x1024xbf16>
    %c0_1 = arith.constant 0 : index
    %c0_2 = arith.constant 0 : index
    %2 = vector.load %arg2[%c0_1, %c0_2] : memref<1024x512xbf16, #tpu.memory_space<vmem>>, vector<1024x512xbf16>
    %cst = arith.constant dense<0.000000e+00> : vector<16x512xf32>
    %3 = tpu.matmul %1, %2, %cst {dimension_numbers = #tpu.dot_dimension_numbers<[1], [0], [0], [1], [0, 0, 1, 1], [], []>} : vector<16x1024xbf16>, vector<1024x512xbf16>, vector<16x512xf32> -> vector<16x512xf32>
    %c0_3 = arith.constant 0 : index
    %c0_4 = arith.constant 0 : index
    %4 = vector.load %arg3[%c0_3, %c0_4] : memref<1x512xf32, #tpu.memory_space<vmem>>, vector<1x512xf32>
    %5 = vector.broadcast %4 : vector<1x512xf32> to vector<16x512xf32>
    %6 = arith.addf %3, %5 : vector<16x512xf32>
    %cst_5 = arith.constant 0.000000e+00 : f32
    %7 = vector.broadcast %cst_5 : f32 to vector<16x512xf32>
    %8 = arith.maximumf %6, %7 : vector<16x512xf32>
    %9 = arith.truncf %8 : vector<16x512xf32> to vector<16x512xbf16>
    %c0_6 = arith.constant 0 : index
    %c0_7 = arith.constant 0 : index
    %10 = vector.load %arg4[%c0_6, %c0_7] : memref<512x128xbf16, #tpu.memory_space<vmem>>, vector<512x128xbf16>
    %cst_8 = arith.constant dense<0.000000e+00> : vector<16x128xf32>
    %11 = tpu.matmul %9, %10, %cst_8 {dimension_numbers = #tpu.dot_dimension_numbers<[1], [0], [0], [1], [0, 0, 1, 1], [], []>} : vector<16x512xbf16>, vector<512x128xbf16>, vector<16x128xf32> -> vector<16x128xf32>
    %c0_9 = arith.constant 0 : index
    %c0_10 = arith.constant 0 : index
    %12 = vector.load %arg5[%c0_9, %c0_10] : memref<1x128xf32, #tpu.memory_space<vmem>>, vector<1x128xf32>
    %13 = vector.broadcast %12 : vector<1x128xf32> to vector<16x128xf32>
    %14 = arith.addf %11, %13 : vector<16x128xf32>
    %c0_11 = arith.constant 0 : index
    %c0_12 = arith.constant 0 : index
    %15 = vector.load %arg6[%c0_11, %c0_12] : memref<16x128xf32, #tpu.memory_space<vmem>>, vector<16x128xf32>
    tpu.vector_store %arg6[%c0_11, %c0_12], %14 {strides = array<i32>} : memref<16x128xf32, #tpu.memory_space<vmem>>, vector<16x128xf32>,
    return
  }
  func.func @transform_0(%arg0: i32) -> (i32, i32) {
    %c0_i32 = arith.constant 0 : i32
    %c0_i32_0 = arith.constant 0 : i32
    return %arg0, %c0_i32 : i32, i32
  }
  func.func @transform_1(%arg0: i32) -> (i32, i32) {
    %c0_i32 = arith.constant 0 : i32
    %c0_i32_0 = arith.constant 0 : i32
    %c0_i32_1 = arith.constant 0 : i32
    return %c0_i32, %c0_i32_0 : i32, i32
  }
  func.func @transform_2(%arg0: i32) -> (i32, i32) {
    %c0_i32 = arith.constant 0 : i32
    %c0_i32_0 = arith.constant 0 : i32
    %c0_i32_1 = arith.constant 0 : i32
    return %c0_i32, %c0_i32_0 : i32, i32
  }
  func.func @transform_3(%arg0: i32) -> (i32, i32) {
    %c0_i32 = arith.constant 0 : i32
    %c0_i32_0 = arith.constant 0 : i32
    %c0_i32_1 = arith.constant 0 : i32
    return %c0_i32, %c0_i32_0 : i32, i32
  }
  func.func @transform_4(%arg0: i32) -> (i32, i32) {
    %c0_i32 = arith.constant 0 : i32
    %c0_i32_0 = arith.constant 0 : i32
    %c0_i32_1 = arith.constant 0 : i32
    return %c0_i32, %c0_i32_0 : i32, i32
  }
  func.func @transform_5(%arg0: i32) -> (i32, i32) {
    %c0_i32 = arith.constant 0 : i32
    %c0_i32_0 = arith.constant 0 : i32
    return %arg0, %c0_i32 : i32, i32
  }
}

</mosaic_0001>

<bundles_post_ra>
// kernel: tpu_custom_call.1
= control target key start
LH: loop header
LB: loop body
LE: loop exit
PB: predicated region body
PF: predicated region fallthrough
CT: control target
= control target key end

     0   :  { %10 = vsyncpa [#allocation3], 0  ;;  %s4272_s0 = inlined_call_operand.hbm [shape: f32[2,1024], index: 0, kind: input, shape index: {}]   ;;  %s4273_s1 = inlined_call_operand.hbm [shape: bf16[1024,512], index: 1, kind: input, shape index: {}]   ;;  %s4274_s2 = inlined_call_operand.hbm [shape: f32[1,512], index: 2, kind: input, shape index: {}]   ;;  %s4275_s3 = inlined_call_operand.hbm [shape: bf16[512,128], index: 3, kind: input, shape index: {}]   ;;  %s4276_s4 = inlined_call_operand.vmem [shape: f32[1,128], index: 4, kind: input, shape index: {}]   ;;  %s4277_s5 = inlined_call_operand.hbm [shape: f32[2,128], index: 5, kind: output, shape index: {}]  }
   0x1   :  { %11 = vsyncpa [#allocation6], 0 }
   0x2   :  { %12 = vsyncpa [#allocation9], 0 }
   0x3   :  { %13 = vsyncpa [#allocation4], 0 }
   0x4   :  { %17 = vsyncadd [#allocation3], 1792  ;;  %s31_s20 = sshll.u32 %s4273_s1, 4  ;;  %s4102_s21 = smov [#allocation5]   ;;  %s32_s20 = int_to_ptr.hbm [resolvable:$true] %s31_s20 }
   0x5   :  { %s33_s22 = sshll.u32 %s4102_s21, 4  ;;  %s18_s25 = sshll.u32 %s4272_s0, 4  ;;  %s34_s22 = int_to_ptr.vmem [resolvable:$true] %s33_s22  ;;  %s19_s25 = int_to_ptr.hbm [resolvable:$true] %s18_s25 }
   0x6   :  { %s4103_s26 = smov 256   ;;  %s4104_s27 = smov 16  }
   0x7   :  { %39 = dma.hbm_to_vmem [thread:$0]  %s32_s20, 32768, %s34_s22, [#allocation6], %s4103_s26, %s4103_s26, %s4104_s27  }
   0x8   :  { %s4105_s28 = smov [#allocation2]   ;;  %s45_s7 = sshll.u32 %s4274_s2, 4  ;;  %s46_s7 = int_to_ptr.hbm [resolvable:$true] %s45_s7 }
   0x9   :  { %s20_s29 = sshll.u32 %s4105_s28, 4  ;;  %s55_s9 = sshll.u32 %s4275_s3, 4  ;;  %s21_s29 = int_to_ptr.vmem [resolvable:$true] %s20_s29  ;;  %s56_s9 = int_to_ptr.hbm [resolvable:$true] %s55_s9 }
   0xa   :  { %26 = dma.hbm_to_vmem [thread:$0]  %s19_s25, 256, %s21_s29, [#allocation3], %s4103_s26, %s4103_s26, %s4104_s27  }
   0xb   :  { %s4106_s10 = smov [#allocation7]   ;;  %s4107_s0 = smov [#allocation8]  }
   0xc   :  { %s47_s11 = sshll.u32 %s4106_s10, 4  ;;  %s57_s12 = sshll.u32 %s4107_s0, 4  ;;  %s48_s11 = int_to_ptr.vmem [resolvable:$true] %s47_s11  ;;  %s58_s12 = int_to_ptr.vmem [resolvable:$true] %s57_s12 }
   0xd   :  { %50 = dma.hbm_to_vmem [thread:$0]  %s46_s7, 64, %s48_s11, [#allocation6]  }
   0xe   :  { %s4108_s13 = smov 64   ;;  %s4109_s14 = smov 4  }
   0xf   :  { %63 = dma.hbm_to_vmem [thread:$0]  %s56_s9, 4096, %s58_s12, [#allocation9], %s4108_s13, %s4108_s13, %s4109_s14  }
  0x10   :  { %4094 = dma.done.wait [#allocation3], 2048  }
  0x11   :  { %4095 = vsyncadd [#allocation3], 4294965248 }
  0x12   :  { %4096 = dma.done.wait [#allocation6], 32832  }
  0x13   :  { %4097 = vsyncadd [#allocation6], 4294934464 }
  0x14   :  { %4098 = dma.done.wait [#allocation9], 4096  }
  0x15   :  { %4099 = vsyncadd [#allocation9], 4294963200  ;;  %v2636_v0 = vld [vmem:[#allocation5 + $0xe0] sm:$0xf]  ;;  %v3704_v1 = vld [vmem:[#allocation5 + $0xec] sm:$0xf0] }
  0x16   :  { %v2764_v2 = vld [vmem:[#allocation5 + $0x1e0] sm:$0xf]  ;;  %v2637_v3 = vor.u32 %v3704_v1, %v2636_v0  ;;  %v3736_v4 = vld [vmem:[#allocation5 + $0x1ec] sm:$0xf0] }
  0x17   :  { %v2892_v5 = vld [vmem:[#allocation5 + $0x2e0] sm:$0xf]  ;;  %v3768_v6 = vld [vmem:[#allocation5 + $0x2ec] sm:$0xf0]  ;;  %v2765_v7 = vor.u32 %v3736_v4, %v2764_v2 }
  0x18   :  { %v2893_v8 = vor.u32 %v3768_v6, %v2892_v5  ;;  %v3020_v9 = vld [vmem:[#allocation5 + $0x3e0] sm:$0xf]  ;;  %v3800_v10 = vld [vmem:[#allocation5 + $0x3ec] sm:$0xf0]  ;;  %1723 = vmatpush.bf16.msra.mxu0 %v2637_v3 }
  0x19   :  { %v2620_v11 = vld [vmem:[#allocation5 + $0xc0] sm:$0xf]  ;;  %v3021_v12 = vor.u32 %v3800_v10, %v3020_v9  ;;  %v3700_v13 = vld [vmem:[#allocation5 + $0xcc] sm:$0xf0]  ;;  %1737 = vmatpush.bf16.msra.mxu1 %v2765_v7 }
  0x1a   :  { %v2748_v14 = vld [vmem:[#allocation5 + $0x1c0] sm:$0xf]  ;;  %v3732_v15 = vld [vmem:[#allocation5 + $0x1cc] sm:$0xf0]  ;;  %1751 = vmatpush.bf16.msra.mxu2 %v2893_v8  ;;  %v2621_v16 = vor.u32 %v3700_v13, %v2620_v11 }
  0x1b   :  { %v2749_v17 = vor.u32 %v3732_v15, %v2748_v14  ;;  %v2876_v18 = vld [vmem:[#allocation5 + $0x2c0] sm:$0xf]  ;;  %v3764_v19 = vld [vmem:[#allocation5 + $0x2cc] sm:$0xf0]  ;;  %1765 = vmatpush.bf16.msra.mxu3 %v3021_v12 }
  0x1c   :  { %v3004_v20 = vld [vmem:[#allocation5 + $0x3c0] sm:$0xf]  ;;  %v2877_v21 = vor.u32 %v3764_v19, %v2876_v18  ;;  %v3796_v22 = vld [vmem:[#allocation5 + $0x3cc] sm:$0xf0]  ;;  %1724 = vmatpush.bf16.msra.mxu0 %v2621_v16 }
  0x1d   :  { %v2604_v23 = vld [vmem:[#allocation5 + $0xa0] sm:$0xf]  ;;  %v3696_v24 = vld [vmem:[#allocation5 + $0xac] sm:$0xf0]  ;;  %v3005_v25 = vor.u32 %v3796_v22, %v3004_v20  ;;  %1738 = vmatpush.bf16.msra.mxu1 %v2749_v17 }
  0x1e   :  { %v2732_v26 = vld [vmem:[#allocation5 + $0x1a0] sm:$0xf]  ;;  %v3728_v27 = vld [vmem:[#allocation5 + $0x1ac] sm:$0xf0]  ;;  %v2605_v29 = vor.u32 %v3696_v24, %v2604_v23  ;;  %1752 = vmatpush.bf16.msra.mxu2 %v2877_v21 }
  0x1f   :  { %v2860_v28 = vld [vmem:[#allocation5 + $0x2a0] sm:$0xf]  ;;  %v3760_v30 = vld [vmem:[#allocation5 + $0x2ac] sm:$0xf0]  ;;  %v2733_v33 = vor.u32 %v3728_v27, %v2732_v26  ;;  %1766 = vmatpush.bf16.msra.mxu3 %v3005_v25 }
  0x20   :  { %v2988_v31 = vld [vmem:[#allocation5 + $0x3a0] sm:$0xf]  ;;  %v3792_v32 = vld [vmem:[#allocation5 + $0x3ac] sm:$0xf0]  ;;  %v2861_v34 = vor.u32 %v3760_v30, %v2860_v28  ;;  %1725 = vmatpush.bf16.msra.mxu0 %v2605_v29 }
  0x21   :  { %v2588_v35 = vld [vmem:[#allocation5 + $0x80] sm:$0xf]  ;;  %v3692_v36 = vld [vmem:[#allocation5 + $0x8c] sm:$0xf0]  ;;  %v2989_v38 = vor.u32 %v3792_v32, %v2988_v31  ;;  %1739 = vmatpush.bf16.msra.mxu1 %v2733_v33 }
  0x22   :  { %v2716_v37 = vld [vmem:[#allocation5 + $0x180] sm:$0xf]  ;;  %v3724_v39 = vld [vmem:[#allocation5 + $0x18c] sm:$0xf0]  ;;  %v2589_v44 = vor.u32 %v3692_v36, %v2588_v35  ;;  %1753 = vmatpush.bf16.msra.mxu2 %v2861_v34 }
  0x23   :  { %v2844_v40 = vld [vmem:[#allocation5 + $0x280] sm:$0xf]  ;;  %v3756_v41 = vld [vmem:[#allocation5 + $0x28c] sm:$0xf0]  ;;  %v2717_v45 = vor.u32 %v3724_v39, %v2716_v37  ;;  %1767 = vmatpush.bf16.msra.mxu3 %v2989_v38 }
  0x24   :  { %v2972_v42 = vld [vmem:[#allocation5 + $0x380] sm:$0xf]  ;;  %v3788_v43 = vld [vmem:[#allocation5 + $0x38c] sm:$0xf0]  ;;  %v2845_v46 = vor.u32 %v3756_v41, %v2844_v40  ;;  %1726 = vmatpush.bf16.msra.mxu0 %v2589_v44 }
  0x25   :  { %v2572_v47 = vld [vmem:[#allocation5 + $0x60] sm:$0xf]  ;;  %v3688_v48 = vld [vmem:[#allocation5 + $0x6c] sm:$0xf0]  ;;  %v2973_v50 = vor.u32 %v3788_v43, %v2972_v42  ;;  %1740 = vmatpush.bf16.msra.mxu1 %v2717_v45 }
  0x26   :  { %v2700_v49 = vld [vmem:[#allocation5 + $0x160] sm:$0xf]  ;;  %v3720_v51 = vld [vmem:[#allocation5 + $0x16c] sm:$0xf0]  ;;  %v2573_v56 = vor.u32 %v3688_v48, %v2572_v47  ;;  %1754 = vmatpush.bf16.msra.mxu2 %v2845_v46 }
  0x27   :  { %v2828_v52 = vld [vmem:[#allocation5 + $0x260] sm:$0xf]  ;;  %v3752_v53 = vld [vmem:[#allocation5 + $0x26c] sm:$0xf0]  ;;  %v2701_v57 = vor.u32 %v3720_v51, %v2700_v49  ;;  %1768 = vmatpush.bf16.msra.mxu3 %v2973_v50 }
  0x28   :  { %v2956_v54 = vld [vmem:[#allocation5 + $0x360] sm:$0xf]  ;;  %v3784_v55 = vld [vmem:[#allocation5 + $0x36c] sm:$0xf0]  ;;  %v2829_v58 = vor.u32 %v3752_v53, %v2828_v52  ;;  %1727 = vmatpush.bf16.msra.mxu0 %v2573_v56 }
  0x29   :  { %v2556_v59 = vld [vmem:[#allocation5 + $0x40] sm:$0xf]  ;;  %v3684_v60 = vld [vmem:[#allocation5 + $0x4c] sm:$0xf0]  ;;  %v2957_v62 = vor.u32 %v3784_v55, %v2956_v54  ;;  %1741 = vmatpush.bf16.msra.mxu1 %v2701_v57 }
  0x2a   :  { %v2684_v61 = vld [vmem:[#allocation5 + $0x140] sm:$0xf]  ;;  %v3716_v63 = vld [vmem:[#allocation5 + $0x14c] sm:$0xf0]  ;;  %v2557_v4 = vor.u32 %v3684_v60, %v2556_v59  ;;  %1755 = vmatpush.bf16.msra.mxu2 %v2829_v58 }
  0x2b   :  { %v2812_v0 = vld [vmem:[#allocation5 + $0x240] sm:$0xf]  ;;  %v3748_v1 = vld [vmem:[#allocation5 + $0x24c] sm:$0xf0]  ;;  %v2685_v5 = vor.u32 %v3716_v63, %v2684_v61  ;;  %1769 = vmatpush.bf16.msra.mxu3 %v2957_v62 }
  0x2c   :  { %v2940_v2 = vld [vmem:[#allocation5 + $0x340] sm:$0xf]  ;;  %v3780_v3 = vld [vmem:[#allocation5 + $0x34c] sm:$0xf0]  ;;  %v2813_v6 = vor.u32 %v3748_v1, %v2812_v0  ;;  %1728 = vmatpush.bf16.msra.mxu0 %v2557_v4 }
  0x2d   :  { %v2540_v7 = vld [vmem:[#allocation5 + $0x20] sm:$0xf]  ;;  %v3680_v8 = vld [vmem:[#allocation5 + $0x2c] sm:$0xf0]  ;;  %v2941_v10 = vor.u32 %v3780_v3, %v2940_v2  ;;  %1742 = vmatpush.bf16.msra.mxu1 %v2685_v5 }
  0x2e   :  { %v2668_v9 = vld [vmem:[#allocation5 + $0x120] sm:$0xf]  ;;  %v3712_v11 = vld [vmem:[#allocation5 + $0x12c] sm:$0xf0]  ;;  %v2541_v16 = vor.u32 %v3680_v8, %v2540_v7  ;;  %1756 = vmatpush.bf16.msra.mxu2 %v2813_v6 }
  0x2f   :  { %v2796_v12 = vld [vmem:[#allocation5 + $0x220] sm:$0xf]  ;;  %v3744_v13 = vld [vmem:[#allocation5 + $0x22c] sm:$0xf0]  ;;  %v2669_v19 = vor.u32 %v3712_v11, %v2668_v9  ;;  %1770 = vmatpush.bf16.msra.mxu3 %v2941_v10 }
  0x30   :  { %v2924_v14 = vld [vmem:[#allocation5 + $0x320] sm:$0xf]  ;;  %v3776_v15 = vld [vmem:[#allocation5 + $0x32c] sm:$0xf0]  ;;  %v2797_v20 = vor.u32 %v3744_v13, %v2796_v12  ;;  %1729 = vmatpush.bf16.msra.mxu0 %v2541_v16 }
  0x31   :  { %v2524_v17 = vld [vmem:[#allocation5] sm:$0xf]  ;;  %v3676_v18 = vld [vmem:[#allocation5 + $0xc] sm:$0xf0]  ;;  %v2925_v24 = vor.u32 %v3776_v15, %v2924_v14  ;;  %1743 = vmatpush.bf16.msra.mxu1 %v2669_v19 }
  0x32   :  { %v2652_v21 = vld [vmem:[#allocation5 + $0x100] sm:$0xf]  ;;  %v3708_v22 = vld [vmem:[#allocation5 + $0x10c] sm:$0xf0]  ;;  %v2525_v31 = vor.u32 %v3676_v18, %v2524_v17  ;;  %1757 = vmatpush.bf16.msra.mxu2 %v2797_v20 }
  0x33   :  { %v2780_v23 = vld [vmem:[#allocation5 + $0x200] sm:$0xf]  ;;  %v3740_v25 = vld [vmem:[#allocation5 + $0x20c] sm:$0xf0]  ;;  %v2653_v35 = vor.u32 %v3708_v22, %v2652_v21  ;;  %1771 = vmatpush.bf16.msra.mxu3 %v2925_v24 }
  0x34   :  { %v2908_v26 = vld [vmem:[#allocation5 + $0x300] sm:$0xf]  ;;  %v3772_v27 = vld [vmem:[#allocation5 + $0x30c] sm:$0xf0]  ;;  %v2781_v36 = vor.u32 %v3740_v25, %v2780_v23  ;;  %1730 = vmatpush.bf16.msra.mxu0 %v2525_v31 }
  0x35   :  { %v3148_v28 = vld [vmem:[#allocation5 + $0x4e0] sm:$0xf]  ;;  %v3832_v29 = vld [vmem:[#allocation5 + $0x4ec] sm:$0xf0]  ;;  %v2909_v39 = vor.u32 %v3772_v27, %v2908_v26  ;;  %1744 = vmatpush.bf16.msra.mxu1 %v2653_v35 }
  0x36   :  { %v3276_v30 = vld [vmem:[#allocation5 + $0x5e0] sm:$0xf]  ;;  %v3864_v32 = vld [vmem:[#allocation5 + $0x5ec] sm:$0xf0]  ;;  %v3149_v40 = vor.u32 %v3832_v29, %v3148_v28  ;;  %1758 = vmatpush.bf16.msra.mxu2 %v2781_v36 }
  0x37   :  { %v3404_v33 = vld [vmem:[#allocation5 + $0x6e0] sm:$0xf]  ;;  %v3896_v34 = vld [vmem:[#allocation5 + $0x6ec] sm:$0xf0]  ;;  %v3277_v43 = vor.u32 %v3864_v32, %v3276_v30  ;;  %1772 = vmatpush.bf16.msra.mxu3 %v2909_v39 }
  0x38   :  { %v3532_v37 = vld [vmem:[#allocation5 + $0x7e0] sm:$0xf]  ;;  %v3928_v38 = vld [vmem:[#allocation5 + $0x7ec] sm:$0xf0]  ;;  %v3405_v44 = vor.u32 %v3896_v34, %v3404_v33  ;;  %1779 = vmatpush.bf16.msrb.mxu0 %v3149_v40 }
  0x39   :  { %v3132_v41 = vld [vmem:[#allocation5 + $0x4c0] sm:$0xf]  ;;  %v3828_v42 = vld [vmem:[#allocation5 + $0x4cc] sm:$0xf0]  ;;  %v3533_v48 = vor.u32 %v3928_v38, %v3532_v37  ;;  %1793 = vmatpush.bf16.msrb.mxu1 %v3277_v43 }
  0x3a   :  { %v3260_v45 = vld [vmem:[#allocation5 + $0x5c0] sm:$0xf]  ;;  %v3860_v46 = vld [vmem:[#allocation5 + $0x5cc] sm:$0xf0]  ;;  %v3133_v56 = vor.u32 %v3828_v42, %v3132_v41  ;;  %1807 = vmatpush.bf16.msrb.mxu2 %v3405_v44 }
  0x3b   :  { %v3388_v47 = vld [vmem:[#allocation5 + $0x6c0] sm:$0xf]  ;;  %v3892_v49 = vld [vmem:[#allocation5 + $0x6cc] sm:$0xf0]  ;;  %v3261_v59 = vor.u32 %v3860_v46, %v3260_v45  ;;  %1821 = vmatpush.bf16.msrb.mxu3 %v3533_v48 }
  0x3c   :  { %v3516_v50 = vld [vmem:[#allocation5 + $0x7c0] sm:$0xf]  ;;  %v3924_v51 = vld [vmem:[#allocation5 + $0x7cc] sm:$0xf0]  ;;  %v3389_v60 = vor.u32 %v3892_v49, %v3388_v47  ;;  %1780 = vmatpush.bf16.msrb.mxu0 %v3133_v56 }
  0x3d   :  { %v3116_v52 = vld [vmem:[#allocation5 + $0x4a0] sm:$0xf]  ;;  %v84_v54 = vld [vmem:[#allocation2 + $0x10] sm:$0xff]  ;;  %v3517_v63 = vor.u32 %v3924_v51, %v3516_v50  ;;  %1794 = vmatpush.bf16.msrb.mxu1 %v3261_v59 }
  0x3e   :  { %v82_v53 = vld [vmem:[#allocation2] sm:$0xff]  ;;  %v3824_v57 = vld [vmem:[#allocation5 + $0x4ac] sm:$0xf0]  ;;  %116 = vst [vmem:[#allocation1 + $0x1] ss:$4 sm:$0xff] %v84_v54  ;;  %1808 = vmatpush.bf16.msrb.mxu2 %v3389_v60 }
  0x3f   :  { %v86_v55 = vld [vmem:[#allocation2 + $0x20] sm:$0xff]  ;;  %v88_v58 = vld [vmem:[#allocation2 + $0x30] sm:$0xff]  ;;  %114 = vst [vmem:[#allocation1] ss:$4 sm:$0xff] %v82_v53  ;;  %v3117_v4 = vor.u32 %v3824_v57, %v3116_v52  ;;  %1822 = vmatpush.bf16.msrb.mxu3 %v3517_v63 }
  0x40   :  { %v3244_v61 = vld [vmem:[#allocation5 + $0x5a0] sm:$0xf]  ;;  %v3856_v62 = vld [vmem:[#allocation5 + $0x5ac] sm:$0xf0]  ;;  %118 = vst [vmem:[#allocation1 + $0x2] ss:$4 sm:$0xff] %v86_v55 }
  0x41   :  { %v3372_v0 = vld [vmem:[#allocation5 + $0x6a0] sm:$0xf]  ;;  %v3888_v1 = vld [vmem:[#allocation5 + $0x6ac] sm:$0xf0]  ;;  %120 = vst [vmem:[#allocation1 + $0x3] ss:$4 sm:$0xff] %v88_v58  ;;  %v3245_v7 = vor.u32 %v3856_v62, %v3244_v61  ;;  %1781 = vmatpush.bf16.msrb.mxu0 %v3117_v4 }
  0x42   :  { %v3500_v2 = vld [vmem:[#allocation5 + $0x7a0] sm:$0xf]  ;;  %v3920_v3 = vld [vmem:[#allocation5 + $0x7ac] sm:$0xf0]  ;;  %v3373_v8 = vor.u32 %v3888_v1, %v3372_v0  ;;  %v83_v61 = vld [vmem:[#allocation2 + $0x8] sm:$0xff] }
  0x43   :  { %v3100_v5 = vld [vmem:[#allocation5 + $0x480] sm:$0xf]  ;;  %v3820_v6 = vld [vmem:[#allocation5 + $0x48c] sm:$0xf0]  ;;  %v3501_v12 = vor.u32 %v3920_v3, %v3500_v2  ;;  %1795 = vmatpush.bf16.msrb.mxu1 %v3245_v7  ;;  %v85_v62 = vld [vmem:[#allocation2 + $0x18] sm:$0xff] }
  0x44   :  { %v3228_v9 = vld [vmem:[#allocation5 + $0x580] sm:$0xf]  ;;  %v3852_v10 = vld [vmem:[#allocation5 + $0x58c] sm:$0xf0]  ;;  %v3101_v19 = vor.u32 %v3820_v6, %v3100_v5  ;;  %1809 = vmatpush.bf16.msrb.mxu2 %v3373_v8  ;;  %v3702_v1 = vld [vmem:[#allocation5 + $0xe4] sm:$0xf] }
  0x45   :  { %v3356_v11 = vld [vmem:[#allocation5 + $0x680] sm:$0xf]  ;;  %v3884_v13 = vld [vmem:[#allocation5 + $0x68c] sm:$0xf0]  ;;  %v3229_v24 = vor.u32 %v3852_v10, %v3228_v9  ;;  %1823 = vmatpush.bf16.msrb.mxu3 %v3501_v12  ;;  %122 = vst [vmem:[#allocation1 + $0x20] ss:$4 sm:$0xff] %v83_v61 }
  0x46   :  { %v3484_v14 = vld [vmem:[#allocation5 + $0x780] sm:$0xf]  ;;  %v3916_v15 = vld [vmem:[#allocation5 + $0x78c] sm:$0xf0]  ;;  %v3357_v25 = vor.u32 %v3884_v13, %v3356_v11  ;;  %1782 = vmatpush.bf16.msrb.mxu0 %v3101_v19  ;;  %v2638_v2 = vld [vmem:[#allocation5 + $0xf0] sm:$0xf0] }
  0x47   :  { %v90_v16 = vld [vmem:[#allocation2 + $0x40] sm:$0xff]  ;;  %v3816_v18 = vld [vmem:[#allocation5 + $0x46c] sm:$0xf0]  ;;  %v3485_v30 = vor.u32 %v3916_v15, %v3484_v14  ;;  %1796 = vmatpush.bf16.msrb.mxu1 %v3229_v24  ;;  %v87_v3 = vld [vmem:[#allocation2 + $0x28] sm:$0xff]  ;;  %124 = vst [vmem:[#allocation1 + $0x21] ss:$4 sm:$0xff] %v85_v62  ;;  %v2641_v24 = vor.u32 %v3702_v1, %v2638_v2 }
  0x48   :  { %v3084_v17 = vld [vmem:[#allocation5 + $0x460] sm:$0xf]  ;;  %v92_v20 = vld [vmem:[#allocation2 + $0x50] sm:$0xff]  ;;  %v129_v32 = vld.sshfl [vmem:[#allocation1] sm:$0xff pattern:$0x73625140]  ;;  %1810 = vmatpush.bf16.msrb.mxu2 %v3357_v25 }
  0x49   :  { %v3212_v21 = vld [vmem:[#allocation5 + $0x560] sm:$0xf]  ;;  %v3848_v22 = vld [vmem:[#allocation5 + $0x56c] sm:$0xf0]  ;;  %v3085_v36 = vor.u32 %v3816_v18, %v3084_v17  ;;  %1824 = vmatpush.bf16.msrb.mxu3 %v3485_v30  ;;  %v89_v4 = vld [vmem:[#allocation2 + $0x38] sm:$0xff] }
  0x4a   :  { %v3340_v23 = vld [vmem:[#allocation5 + $0x660] sm:$0xf]  ;;  %v3880_v27 = vld [vmem:[#allocation5 + $0x66c] sm:$0xf0]  ;;  %v3213_v39 = vor.u32 %v3848_v22, %v3212_v21  ;;  %126 = vst [vmem:[#allocation1 + $0x22] ss:$4 sm:$0xff] %v87_v3 }
  0x4b   :  { %v94_v26 = vld [vmem:[#allocation2 + $0x60] sm:$0xff]  ;;  %v3912_v29 = vld [vmem:[#allocation5 + $0x76c] sm:$0xf0]  ;;  %v131_v34 = vld.sshfl [vmem:[#allocation1 + $0x10] sm:$0xff pattern:$0x73625140]  ;;  %v3341_v40 = vor.u32 %v3880_v27, %v3340_v23  ;;  %1783 = vmatpush.bf16.msrb.mxu0 %v3085_v36 }
  0x4c   :  { %v3468_v28 = vld [vmem:[#allocation5 + $0x760] sm:$0xf]  ;;  %v96_v31 = vld [vmem:[#allocation2 + $0x70] sm:$0xff]  ;;  %1797 = vmatpush.bf16.msrb.mxu1 %v3213_v39  ;;  %v3734_v23 = vld [vmem:[#allocation5 + $0x1e4] sm:$0xf] }
  0x4d   :  { %v4155_v33 = vld.sshfl [vmem:[#allocation1 + $0x8] sm:$0xff pattern:$0x73625140]  ;;  %v4157_v35 = vld.sshfl [vmem:[#allocation1 + $0x18] sm:$0xff pattern:$0x73625140]  ;;  %v3469_v43 = vor.u32 %v3912_v29, %v3468_v28  ;;  %1811 = vmatpush.bf16.msrb.mxu2 %v3341_v40 }
  0x4e   :  { %137 = vst [vmem:[#allocation1] ss:$4 sm:$0xff] %v90_v16  ;;  %v3068_v37 = vld [vmem:[#allocation5 + $0x440] sm:$0xf]  ;;  %v3812_v38 = vld [vmem:[#allocation5 + $0x44c] sm:$0xf0] }
  0x4f   :  { %138 = vst [vmem:[#allocation1 + $0x1] ss:$4 sm:$0xff] %v92_v20  ;;  %v3196_v41 = vld [vmem:[#allocation5 + $0x540] sm:$0xf]  ;;  %v3844_v42 = vld [vmem:[#allocation5 + $0x54c] sm:$0xf0]  ;;  %v3069_v48 = vor.u32 %v3812_v38, %v3068_v37  ;;  %1825 = vmatpush.bf16.msrb.mxu3 %v3469_v43 }
  0x50   :  { %139 = vst [vmem:[#allocation1 + $0x2] ss:$4 sm:$0xff] %v94_v26  ;;  %v3324_v44 = vld [vmem:[#allocation5 + $0x640] sm:$0xf]  ;;  %v3876_v45 = vld [vmem:[#allocation5 + $0x64c] sm:$0xf0]  ;;  %v3197_v50 = vor.u32 %v3844_v42, %v3196_v41 }
  0x51   :  { %140 = vst [vmem:[#allocation1 + $0x3] ss:$4 sm:$0xff] %v96_v31  ;;  %v3452_v46 = vld [vmem:[#allocation5 + $0x740] sm:$0xf]  ;;  %v3908_v47 = vld [vmem:[#allocation5 + $0x74c] sm:$0xf0]  ;;  %v3325_v51 = vor.u32 %v3876_v45, %v3324_v44  ;;  %1784 = vmatpush.bf16.msrb.mxu0 %v3069_v48 }
  0x52   :  { %v3052_v49 = vld [vmem:[#allocation5 + $0x420] sm:$0xf]  ;;  %v3808_v52 = vld [vmem:[#allocation5 + $0x42c] sm:$0xf0]  ;;  %v3453_v55 = vor.u32 %v3908_v47, %v3452_v46  ;;  %1798 = vmatpush.bf16.msrb.mxu1 %v3197_v50  ;;  %v2766_v25 = vld [vmem:[#allocation5 + $0x1f0] sm:$0xf0] }
  0x53   :  { %v3180_v53 = vld [vmem:[#allocation5 + $0x520] sm:$0xf]  ;;  %v3840_v54 = vld [vmem:[#allocation5 + $0x52c] sm:$0xf0]  ;;  %v3053_v63 = vor.u32 %v3808_v52, %v3052_v49  ;;  %1812 = vmatpush.bf16.msrb.mxu2 %v3325_v51  ;;  %v3766_v26 = vld [vmem:[#allocation5 + $0x2e4] sm:$0xf] }
  0x54   :  { %v3308_v56 = vld [vmem:[#allocation5 + $0x620] sm:$0xf]  ;;  %v3872_v57 = vld [vmem:[#allocation5 + $0x62c] sm:$0xf0]  ;;  %1826 = vmatpush.bf16.msrb.mxu3 %v3453_v55  ;;  %v3181_v7 = vor.u32 %v3840_v54, %v3180_v53  ;;  %128 = vst [vmem:[#allocation1 + $0x23] ss:$4 sm:$0xff] %v89_v4 }
  0x55   :  { %v3436_v58 = vld [vmem:[#allocation5 + $0x720] sm:$0xf]  ;;  %v3904_v59 = vld [vmem:[#allocation5 + $0x72c] sm:$0xf0]  ;;  %v3309_v16 = vor.u32 %v3872_v57, %v3308_v56  ;;  %1785 = vmatpush.bf16.msrb.mxu0 %v3053_v63  ;;  %v2894_v27 = vld [vmem:[#allocation5 + $0x2f0] sm:$0xf0] }
  0x56   :  { %v3036_v60 = vld [vmem:[#allocation5 + $0x400] sm:$0xf]  ;;  %v3804_v0 = vld [vmem:[#allocation5 + $0x40c] sm:$0xf0]  ;;  %v3437_v17 = vor.u32 %v3904_v59, %v3436_v58  ;;  %v3798_v28 = vld [vmem:[#allocation5 + $0x3e4] sm:$0xf]  ;;  %1799 = vmatpush.bf16.msrb.mxu1 %v3181_v7  ;;  %v2897_v37 = vor.u32 %v3766_v26, %v2894_v27 }
  0x57   :  { %v3164_v8 = vld [vmem:[#allocation5 + $0x500] sm:$0xf]  ;;  %v3836_v9 = vld [vmem:[#allocation5 + $0x50c] sm:$0xf0]  ;;  %v3037_v21 = vor.u32 %v3804_v0, %v3036_v60  ;;  %v3022_v29 = vld [vmem:[#allocation5 + $0x3f0] sm:$0xf0]  ;;  %1813 = vmatpush.bf16.msrb.mxu2 %v3309_v16 }
  0x58   :  { %v145_v5 = vld.sshfl [vmem:[#allocation1] sm:$0xff pattern:$0x73625140]  ;;  %v147_v6 = vld.sshfl [vmem:[#allocation1 + $0x10] sm:$0xff pattern:$0x73625140]  ;;  %v3165_v30 = vor.u32 %v3836_v9, %v3164_v8  ;;  %1827 = vmatpush.bf16.msrb.mxu3 %v3437_v17  ;;  %v3025_v38 = vor.u32 %v3798_v28, %v3022_v29 }
  0x59   :  { %v3292_v10 = vld [vmem:[#allocation5 + $0x600] sm:$0xf]  ;;  %v3868_v11 = vld [vmem:[#allocation5 + $0x60c] sm:$0xf0]  ;;  %v4159_v12 = vpack.c.bf16 %v145_v5, %v129_v32  ;;  %v4161_v13 = vpack.c.bf16 %v147_v6, %v131_v34  ;;  %v3698_v32 = vld [vmem:[#allocation5 + $0xc4] sm:$0xf]  ;;  %1786 = vmatpush.bf16.msrb.mxu0 %v3037_v21 }
  0x5a   :  { %v146_v14 = vld.sshfl [vmem:[#allocation1 + $0x8] sm:$0xff pattern:$0x73625140]  ;;  %v148_v15 = vld.sshfl [vmem:[#allocation1 + $0x18] sm:$0xff pattern:$0x73625140]  ;;  %v3293_v31 = vor.u32 %v3868_v11, %v3292_v10  ;;  %1800 = vmatpush.bf16.msrb.mxu1 %v3165_v30 }
  0x5b   :  { %v3420_v18 = vld [vmem:[#allocation5 + $0x700] sm:$0xf]  ;;  %v4164_v19 = vpack.c.bf16 %v146_v14, %v4155_v33  ;;  %v4167_v20 = vpack.c.bf16 %v148_v15, %v4157_v35  ;;  %v3900_v22 = vld [vmem:[#allocation5 + $0x70c] sm:$0xf0]  ;;  %1731 = vmatmul.bf16.vlgmr.msra.gmra.mxu0 %v4159_v12  ;;  %1759 = vmatmul.bf16.vlgmr.msra.gmra.mxu2 %v4161_v13  ;;  %v2622_v33 = vld [vmem:[#allocation5 + $0xd0] sm:$0xf0]  ;;  %v2769_v35 = vor.u32 %v3734_v23, %v2766_v25 }
  0x5c   :  { %v3421_v34 = vor.u32 %v3900_v22, %v3420_v18  ;;  %v3730_v36 = vld [vmem:[#allocation5 + $0x1c4] sm:$0xf]  ;;  %v91_v39 = vld [vmem:[#allocation2 + $0x48] sm:$0xff]  ;;  %v2750_v40 = vld [vmem:[#allocation5 + $0x1d0] sm:$0xf0]  ;;  %v2625_v44 = vor.u32 %v3698_v32, %v2622_v33  ;;  %1814 = vmatpush.bf16.msrb.mxu2 %v3293_v31 }
  0x5d   :  { %1745 = vmatmul.bf16.vlgmr.msra.gmra.mxu1 %v4164_v19  ;;  %1773 = vmatmul.bf16.vlgmr.msra.gmra.mxu3 %v4167_v20  ;;  %v3762_v41 = vld [vmem:[#allocation5 + $0x2c4] sm:$0xf]  ;;  %v2878_v42 = vld [vmem:[#allocation5 + $0x2d0] sm:$0xf0]  ;;  %v93_v43 = vld [vmem:[#allocation2 + $0x58] sm:$0xff]  ;;  %v2753_v55 = vor.u32 %v3730_v36, %v2750_v40 }
  0x5e   :  { %1835 = vmatpush.bf16.msra.mxu0 %v2641_v24  ;;  %v3794_v45 = vld [vmem:[#allocation5 + $0x3c4] sm:$0xf]  ;;  %v3006_v46 = vld [vmem:[#allocation5 + $0x3d0] sm:$0xf0]  ;;  %v95_v48 = vld [vmem:[#allocation2 + $0x68] sm:$0xff]  ;;  %1828 = vmatpush.bf16.msrb.mxu3 %v3421_v34  ;;  %v2881_v60 = vor.u32 %v3762_v41, %v2878_v42 }
  0x5f   :  { %v3694_v47 = vld [vmem:[#allocation5 + $0xa4] sm:$0xf]  ;;  %v2606_v49 = vld [vmem:[#allocation5 + $0xb0] sm:$0xf0]  ;;  %1849 = vmatpush.bf16.msra.mxu1 %v2769_v35  ;;  %v97_v52 = vld [vmem:[#allocation2 + $0x78] sm:$0xff]  ;;  %v3009_v61 = vor.u32 %v3794_v45, %v3006_v46 }
  0x60   :  { %v3726_v50 = vld [vmem:[#allocation5 + $0x1a4] sm:$0xf]  ;;  %v2734_v51 = vld [vmem:[#allocation5 + $0x1b0] sm:$0xf0]  ;;  %1863 = vmatpush.bf16.msra.mxu2 %v2897_v37  ;;  %v2609_v62 = vor.u32 %v3694_v47, %v2606_v49 }
  0x61   :  { %v133_v53 = vld.sshfl [vmem:[#allocation1 + $0x20] sm:$0xff pattern:$0x73625140]  ;;  %v4173_v54 = vld.sshfl [vmem:[#allocation1 + $0x28] sm:$0xff pattern:$0x73625140]  ;;  %v2737_v3 = vor.u32 %v3726_v50, %v2734_v51 }
  0x62   :  { %v3758_v56 = vld [vmem:[#allocation5 + $0x2a4] sm:$0xf]  ;;  %v2862_v57 = vld [vmem:[#allocation5 + $0x2b0] sm:$0xf0]  ;;  %1877 = vmatpush.bf16.msra.mxu3 %v3025_v38  ;;  %1836 = vmatpush.bf16.msra.mxu0 %v2625_v44 }
  0x63   :  { %v135_v58 = vld.sshfl [vmem:[#allocation1 + $0x30] sm:$0xff pattern:$0x73625140]  ;;  %v136_v59 = vld.sshfl [vmem:[#allocation1 + $0x38] sm:$0xff pattern:$0x73625140]  ;;  %1850 = vmatpush.bf16.msra.mxu1 %v2753_v55  ;;  %v2865_v5 = vor.u32 %v3758_v56, %v2862_v57 }
  0x64   :  { %141 = vst [vmem:[#allocation1 + $0x20] ss:$4 sm:$0xff] %v91_v39  ;;  %v3790_v63 = vld [vmem:[#allocation5 + $0x3a4] sm:$0xf]  ;;  %v2990_v0 = vld [vmem:[#allocation5 + $0x3b0] sm:$0xf0]  ;;  %1864 = vmatpush.bf16.msra.mxu2 %v2881_v60 }
  0x65   :  { %142 = vst [vmem:[#allocation1 + $0x21] ss:$4 sm:$0xff] %v93_v43  ;;  %v3690_v1 = vld [vmem:[#allocation5 + $0x84] sm:$0xf]  ;;  %v2590_v2 = vld [vmem:[#allocation5 + $0x90] sm:$0xf0]  ;;  %v2993_v6 = vor.u32 %v3790_v63, %v2990_v0 }
  0x66   :  { %143 = vst [vmem:[#allocation1 + $0x22] ss:$4 sm:$0xff] %v95_v48  ;;  %v3722_v4 = vld [vmem:[#allocation5 + $0x184] sm:$0xf]  ;;  %1878 = vmatpush.bf16.msra.mxu3 %v3009_v61  ;;  %v2718_v7 = vld [vmem:[#allocation5 + $0x190] sm:$0xf0]  ;;  %1837 = vmatpush.bf16.msra.mxu0 %v2609_v62  ;;  %v2593_v9 = vor.u32 %v3690_v1, %v2590_v2 }
  0x67   :  { %144 = vst [vmem:[#allocation1 + $0x23] ss:$4 sm:$0xff] %v97_v52  ;;  %v3754_v8 = vld [vmem:[#allocation5 + $0x284] sm:$0xf]  ;;  %v2846_v10 = vld [vmem:[#allocation5 + $0x290] sm:$0xf0]  ;;  %1851 = vmatpush.bf16.msra.mxu1 %v2737_v3  ;;  %v2721_v17 = vor.u32 %v3722_v4, %v2718_v7 }
  0x68   :  { %v3786_v11 = vld [vmem:[#allocation5 + $0x384] sm:$0xf]  ;;  %v2974_v14 = vld [vmem:[#allocation5 + $0x390] sm:$0xf0]  ;;  %1865 = vmatpush.bf16.msra.mxu2 %v2865_v5  ;;  %v2849_v18 = vor.u32 %v3754_v8, %v2846_v10 }
  0x69   :  { %v3686_v15 = vld [vmem:[#allocation5 + $0x64] sm:$0xf]  ;;  %v2574_v16 = vld [vmem:[#allocation5 + $0x70] sm:$0xf0]  ;;  %v2977_v21 = vor.u32 %v3786_v11, %v2974_v14 }
  0x6a   :  { %1879 = vmatpush.bf16.msra.mxu3 %v2993_v6  ;;  %v3718_v22 = vld [vmem:[#allocation5 + $0x164] sm:$0xf]  ;;  %v2702_v23 = vld [vmem:[#allocation5 + $0x170] sm:$0xf0]  ;;  %1838 = vmatpush.bf16.msra.mxu0 %v2593_v9  ;;  %v2577_v24 = vor.u32 %v3686_v15, %v2574_v16 }
  0x6b   :  { %v3750_v25 = vld [vmem:[#allocation5 + $0x264] sm:$0xf]  ;;  %v2830_v26 = vld [vmem:[#allocation5 + $0x270] sm:$0xf0]  ;;  %1852 = vmatpush.bf16.msra.mxu1 %v2721_v17  ;;  %v2705_v33 = vor.u32 %v3718_v22, %v2702_v23 }
  0x6c   :  { %v3782_v27 = vld [vmem:[#allocation5 + $0x364] sm:$0xf]  ;;  %v2958_v28 = vld [vmem:[#allocation5 + $0x370] sm:$0xf0]  ;;  %1866 = vmatpush.bf16.msra.mxu2 %v2849_v18  ;;  %v2833_v40 = vor.u32 %v3750_v25, %v2830_v26 }
  0x6d   :  { %v3682_v29 = vld [vmem:[#allocation5 + $0x44] sm:$0xf]  ;;  %v2558_v30 = vld [vmem:[#allocation5 + $0x50] sm:$0xf0]  ;;  %v2961_v43 = vor.u32 %v3782_v27, %v2958_v28 }
  0x6e   :  { %v149_v31 = vld.sshfl [vmem:[#allocation1 + $0x20] sm:$0xff pattern:$0x73625140]  ;;  %v151_v32 = vld.sshfl [vmem:[#allocation1 + $0x30] sm:$0xff pattern:$0x73625140]  ;;  %1880 = vmatpush.bf16.msra.mxu3 %v2977_v21  ;;  %1839 = vmatpush.bf16.msra.mxu0 %v2577_v24  ;;  %v2561_v44 = vor.u32 %v3682_v29, %v2558_v30 }
  0x6f   :  { %v3714_v34 = vld [vmem:[#allocation5 + $0x144] sm:$0xf]  ;;  %v2686_v35 = vld [vmem:[#allocation5 + $0x150] sm:$0xf0]  ;;  %v4175_v36 = vpack.c.bf16 %v149_v31, %v133_v53  ;;  %v4177_v37 = vpack.c.bf16 %v151_v32, %v135_v58  ;;  %1853 = vmatpush.bf16.msra.mxu1 %v2705_v33 }
  0x70   :  { %v150_v38 = vld.sshfl [vmem:[#allocation1 + $0x28] sm:$0xff pattern:$0x73625140]  ;;  %v152_v39 = vld.sshfl [vmem:[#allocation1 + $0x38] sm:$0xff pattern:$0x73625140]  ;;  %1867 = vmatpush.bf16.msra.mxu2 %v2833_v40  ;;  %v2689_v51 = vor.u32 %v3714_v34, %v2686_v35 }
  0x71   :  { %v4180_v41 = vpack.c.bf16 %v150_v38, %v4173_v54  ;;  %v4182_v42 = vpack.c.bf16 %v152_v39, %v136_v59  ;;  %v3746_v45 = vld [vmem:[#allocation5 + $0x244] sm:$0xf]  ;;  %v2814_v46 = vld [vmem:[#allocation5 + $0x250] sm:$0xf0]  ;;  %1787 = vmatmul.bf16.vlgmr.msrb.gmra.mxu0 %v4175_v36  ;;  %1815 = vmatmul.bf16.vlgmr.msrb.gmra.mxu2 %v4177_v37 }
  0x72   :  { %v3778_v47 = vld [vmem:[#allocation5 + $0x344] sm:$0xf]  ;;  %v2942_v48 = vld [vmem:[#allocation5 + $0x350] sm:$0xf0]  ;;  %v2817_v52 = vor.u32 %v3746_v45, %v2814_v46  ;;  %1881 = vmatpush.bf16.msra.mxu3 %v2961_v43  ;;  %1840 = vmatpush.bf16.msra.mxu0 %v2561_v44 }
  0x73   :  { %v3678_v49 = vld [vmem:[#allocation5 + $0x24] sm:$0xf]  ;;  %v2542_v50 = vld [vmem:[#allocation5 + $0x30] sm:$0xf0]  ;;  %1801 = vmatmul.bf16.vlgmr.msrb.gmra.mxu1 %v4180_v41  ;;  %1829 = vmatmul.bf16.vlgmr.msrb.gmra.mxu3 %v4182_v42  ;;  %v2945_v55 = vor.u32 %v3778_v47, %v2942_v48 }
  0x74   :  { %v3710_v53 = vld [vmem:[#allocation5 + $0x124] sm:$0xf]  ;;  %v2670_v54 = vld [vmem:[#allocation5 + $0x130] sm:$0xf0]  ;;  %v2545_v56 = vor.u32 %v3678_v49, %v2542_v50  ;;  %1854 = vmatpush.bf16.msra.mxu1 %v2689_v51  ;;  %1868 = vmatpush.bf16.msra.mxu2 %v2817_v52 }
  0x75   :  { %v3742_v57 = vld [vmem:[#allocation5 + $0x224] sm:$0xf]  ;;  %v2798_v58 = vld [vmem:[#allocation5 + $0x230] sm:$0xf0]  ;;  %v2673_v1 = vor.u32 %v3710_v53, %v2670_v54 }
  0x76   :  { %v3774_v59 = vld [vmem:[#allocation5 + $0x324] sm:$0xf]  ;;  %v2926_v60 = vld [vmem:[#allocation5 + $0x330] sm:$0xf0]  ;;  %v2801_v2 = vor.u32 %v3742_v57, %v2798_v58  ;;  %1882 = vmatpush.bf16.msra.mxu3 %v2945_v55  ;;  %1841 = vmatpush.bf16.msra.mxu0 %v2545_v56 }
  0x77   :  { %v3674_v61 = vld [vmem:[#allocation5 + $0x4] sm:$0xf]  ;;  %v2526_v62 = vld [vmem:[#allocation5 + $0x10] sm:$0xf0]  ;;  %v2929_v6 = vor.u32 %v3774_v59, %v2926_v60 }
  0x78   :  { %v3830_v63 = vld [vmem:[#allocation5 + $0x4e4] sm:$0xf]  ;;  %v3150_v0 = vld [vmem:[#allocation5 + $0x4f0] sm:$0xf0]  ;;  %v2529_v7 = vor.u32 %v3674_v61, %v2526_v62  ;;  %1855 = vmatpush.bf16.msra.mxu1 %v2673_v1  ;;  %1869 = vmatpush.bf16.msra.mxu2 %v2801_v2 }
  0x79   :  { %v3706_v3 = vld [vmem:[#allocation5 + $0x104] sm:$0xf]  ;;  %v2654_v4 = vld [vmem:[#allocation5 + $0x110] sm:$0xf0]  ;;  %v3153_v11 = vor.u32 %v3830_v63, %v3150_v0 }
  0x7a   :  { %v3738_v5 = vld [vmem:[#allocation5 + $0x204] sm:$0xf]  ;;  %v2782_v8 = vld [vmem:[#allocation5 + $0x210] sm:$0xf0]  ;;  %v2657_v22 = vor.u32 %v3706_v3, %v2654_v4  ;;  %1883 = vmatpush.bf16.msra.mxu3 %v2929_v6  ;;  %1842 = vmatpush.bf16.msra.mxu0 %v2529_v7 }
  0x7b   :  { %v3770_v9 = vld [vmem:[#allocation5 + $0x304] sm:$0xf]  ;;  %v2910_v10 = vld [vmem:[#allocation5 + $0x310] sm:$0xf0]  ;;  %v2785_v23 = vor.u32 %v3738_v5, %v2782_v8 }
  0x7c   :  { %v3862_v14 = vld [vmem:[#allocation5 + $0x5e4] sm:$0xf]  ;;  %v3278_v15 = vld [vmem:[#allocation5 + $0x5f0] sm:$0xf0]  ;;  %v2913_v26 = vor.u32 %v3770_v9, %v2910_v10  ;;  %1856 = vmatpush.bf16.msra.mxu1 %v2657_v22 }
  0x7d   :  { %v3894_v16 = vld [vmem:[#allocation5 + $0x6e4] sm:$0xf]  ;;  %v3406_v17 = vld [vmem:[#allocation5 + $0x6f0] sm:$0xf0]  ;;  %v3281_v27 = vor.u32 %v3862_v14, %v3278_v15  ;;  %1870 = vmatpush.bf16.msra.mxu2 %v2785_v23 }
  0x7e   :  { %v3926_v18 = vld [vmem:[#allocation5 + $0x7e4] sm:$0xf]  ;;  %v3534_v21 = vld [vmem:[#allocation5 + $0x7f0] sm:$0xf0]  ;;  %1891 = vmatpush.bf16.msrb.mxu0 %v3153_v11  ;;  %v3409_v28 = vor.u32 %v3894_v16, %v3406_v17  ;;  %1884 = vmatpush.bf16.msra.mxu3 %v2913_v26 }
  0x7f   :  { %v3826_v24 = vld [vmem:[#allocation5 + $0x4c4] sm:$0xf]  ;;  %v3134_v25 = vld [vmem:[#allocation5 + $0x4d0] sm:$0xf0]  ;;  %v3537_v29 = vor.u32 %v3926_v18, %v3534_v21 }
  0x80   :  { %v3858_v30 = vld [vmem:[#allocation5 + $0x5c4] sm:$0xf]  ;;  %v3262_v31 = vld [vmem:[#allocation5 + $0x5d0] sm:$0xf0]  ;;  %v3137_v33 = vor.u32 %v3826_v24, %v3134_v25  ;;  %1905 = vmatpush.bf16.msrb.mxu1 %v3281_v27 }
  0x81   :  { %v3890_v32 = vld [vmem:[#allocation5 + $0x6c4] sm:$0xf]  ;;  %v3390_v34 = vld [vmem:[#allocation5 + $0x6d0] sm:$0xf0]  ;;  %v3265_v43 = vor.u32 %v3858_v30, %v3262_v31  ;;  %1919 = vmatpush.bf16.msrb.mxu2 %v3409_v28  ;;  %1843 = vmatmul.bf16.vlgmr.msra.gmra.mxu0 %v4159_v12 }
  0x82   :  { %v3922_v35 = vld [vmem:[#allocation5 + $0x7c4] sm:$0xf]  ;;  %v3518_v38 = vld [vmem:[#allocation5 + $0x7d0] sm:$0xf0]  ;;  %1933 = vmatpush.bf16.msrb.mxu3 %v3537_v29  ;;  %v3393_v44 = vor.u32 %v3890_v32, %v3390_v34  ;;  %1892 = vmatpush.bf16.msrb.mxu0 %v3137_v33 }
  0x83   :  { %v3822_v39 = vld [vmem:[#allocation5 + $0x4a4] sm:$0xf]  ;;  %v3118_v40 = vld [vmem:[#allocation5 + $0x4b0] sm:$0xf0]  ;;  %v3521_v45 = vor.u32 %v3922_v35, %v3518_v38  ;;  %1871 = vmatmul.bf16.vlgmr.msra.gmra.mxu2 %v4161_v13  ;;  %1857 = vmatmul.bf16.vlgmr.msra.gmra.mxu1 %v4164_v19 }
  0x84   :  { %v3854_v46 = vld [vmem:[#allocation5 + $0x5a4] sm:$0xf]  ;;  %v3246_v47 = vld [vmem:[#allocation5 + $0x5b0] sm:$0xf0]  ;;  %v3121_v49 = vor.u32 %v3822_v39, %v3118_v40  ;;  %1906 = vmatpush.bf16.msrb.mxu1 %v3265_v43  ;;  %1885 = vmatmul.bf16.vlgmr.msra.gmra.mxu3 %v4167_v20 }
  0x85   :  { %v3886_v48 = vld [vmem:[#allocation5 + $0x6a4] sm:$0xf]  ;;  %v3374_v50 = vld [vmem:[#allocation5 + $0x6b0] sm:$0xf0]  ;;  %v3249_v55 = vor.u32 %v3854_v46, %v3246_v47  ;;  %1920 = vmatpush.bf16.msrb.mxu2 %v3393_v44 }
  0x86   :  { %v3918_v51 = vld [vmem:[#allocation5 + $0x7a4] sm:$0xf]  ;;  %v3502_v52 = vld [vmem:[#allocation5 + $0x7b0] sm:$0xf0]  ;;  %1934 = vmatpush.bf16.msrb.mxu3 %v3521_v45  ;;  %v3377_v56 = vor.u32 %v3886_v48, %v3374_v50  ;;  %1893 = vmatpush.bf16.msrb.mxu0 %v3121_v49  ;;  %v2644_v49 = vld [vmem:[#allocation5 + $0xe8] sm:$0xf] }
  0x87   :  { %v3818_v53 = vld [vmem:[#allocation5 + $0x484] sm:$0xf]  ;;  %v3102_v54 = vld [vmem:[#allocation5 + $0x490] sm:$0xf0]  ;;  %v3505_v57 = vor.u32 %v3918_v51, %v3502_v52  ;;  %v3705_v50 = vld [vmem:[#allocation5 + $0xf4] sm:$0xf0] }
  0x88   :  { %v3850_v58 = vld [vmem:[#allocation5 + $0x584] sm:$0xf]  ;;  %v3230_v59 = vld [vmem:[#allocation5 + $0x590] sm:$0xf0]  ;;  %v3105_v61 = vor.u32 %v3818_v53, %v3102_v54  ;;  %1907 = vmatpush.bf16.msrb.mxu1 %v3249_v55 }
  0x89   :  { %v3882_v60 = vld [vmem:[#allocation5 + $0x684] sm:$0xf]  ;;  %v3358_v62 = vld [vmem:[#allocation5 + $0x690] sm:$0xf0]  ;;  %v3233_v3 = vor.u32 %v3850_v58, %v3230_v59  ;;  %1921 = vmatpush.bf16.msrb.mxu2 %v3377_v56  ;;  %v2772_v59 = vld [vmem:[#allocation5 + $0x1e8] sm:$0xf] }
  0x8a   :  { %v3914_v63 = vld [vmem:[#allocation5 + $0x784] sm:$0xf]  ;;  %v3486_v0 = vld [vmem:[#allocation5 + $0x790] sm:$0xf0]  ;;  %1935 = vmatpush.bf16.msrb.mxu3 %v3505_v57  ;;  %v3361_v4 = vor.u32 %v3882_v60, %v3358_v62  ;;  %1894 = vmatpush.bf16.msrb.mxu0 %v3105_v61  ;;  %v2645_v60 = vor.u32 %v3705_v50, %v2644_v49  ;;  %v3737_v61 = vld [vmem:[#allocation5 + $0x1f4] sm:$0xf0] }
  0x8b   :  { %v3814_v1 = vld [vmem:[#allocation5 + $0x464] sm:$0xf]  ;;  %v3086_v2 = vld [vmem:[#allocation5 + $0x470] sm:$0xf0]  ;;  %v3489_v5 = vor.u32 %v3914_v63, %v3486_v0  ;;  %v2900_v62 = vld [vmem:[#allocation5 + $0x2e8] sm:$0xf] }
  0x8c   :  { %v3846_v6 = vld [vmem:[#allocation5 + $0x564] sm:$0xf]  ;;  %v3214_v7 = vld [vmem:[#allocation5 + $0x570] sm:$0xf0]  ;;  %v3089_v9 = vor.u32 %v3814_v1, %v3086_v2  ;;  %1908 = vmatpush.bf16.msrb.mxu1 %v3233_v3  ;;  %v3769_v63 = vld [vmem:[#allocation5 + $0x2f4] sm:$0xf0] }
  0x8d   :  { %v3878_v8 = vld [vmem:[#allocation5 + $0x664] sm:$0xf]  ;;  %v3342_v10 = vld [vmem:[#allocation5 + $0x670] sm:$0xf0]  ;;  %v3217_v17 = vor.u32 %v3846_v6, %v3214_v7  ;;  %1922 = vmatpush.bf16.msrb.mxu2 %v3361_v4  ;;  %v3028_v1 = vld [vmem:[#allocation5 + $0x3e8] sm:$0xf]  ;;  %v2901_v6 = vor.u32 %v3769_v63, %v2900_v62 }
  0x8e   :  { %v3910_v11 = vld [vmem:[#allocation5 + $0x764] sm:$0xf]  ;;  %v3470_v14 = vld [vmem:[#allocation5 + $0x770] sm:$0xf0]  ;;  %1936 = vmatpush.bf16.msrb.mxu3 %v3489_v5  ;;  %v3345_v18 = vor.u32 %v3878_v8, %v3342_v10  ;;  %1895 = vmatpush.bf16.msrb.mxu0 %v3089_v9  ;;  %v3801_v2 = vld [vmem:[#allocation5 + $0x3f4] sm:$0xf0]  ;;  %v2773_v5 = vor.u32 %v3737_v61, %v2772_v59 }
  0x8f   :  { %v3810_v15 = vld [vmem:[#allocation5 + $0x444] sm:$0xf]  ;;  %v3070_v16 = vld [vmem:[#allocation5 + $0x450] sm:$0xf0]  ;;  %v3473_v21 = vor.u32 %v3910_v11, %v3470_v14  ;;  %v2628_v7 = vld [vmem:[#allocation5 + $0xc8] sm:$0xf]  ;;  %v3029_v10 = vor.u32 %v3801_v2, %v3028_v1 }
  0x90   :  { %v3842_v22 = vld [vmem:[#allocation5 + $0x544] sm:$0xf]  ;;  %v3198_v23 = vld [vmem:[#allocation5 + $0x550] sm:$0xf0]  ;;  %v3073_v25 = vor.u32 %v3810_v15, %v3070_v16  ;;  %1909 = vmatpush.bf16.msrb.mxu1 %v3217_v17  ;;  %v3701_v8 = vld [vmem:[#allocation5 + $0xd4] sm:$0xf0] }
  0x91   :  { %v3874_v24 = vld [vmem:[#allocation5 + $0x644] sm:$0xf]  ;;  %v3326_v26 = vld [vmem:[#allocation5 + $0x650] sm:$0xf0]  ;;  %v3201_v31 = vor.u32 %v3842_v22, %v3198_v23  ;;  %1923 = vmatpush.bf16.msrb.mxu2 %v3345_v18  ;;  %v2756_v9 = vld [vmem:[#allocation5 + $0x1c8] sm:$0xf]  ;;  %v2629_v18 = vor.u32 %v3701_v8, %v2628_v7 }
  0x92   :  { %v3906_v27 = vld [vmem:[#allocation5 + $0x744] sm:$0xf]  ;;  %v3454_v28 = vld [vmem:[#allocation5 + $0x750] sm:$0xf0]  ;;  %1937 = vmatpush.bf16.msrb.mxu3 %v3473_v21  ;;  %v3329_v32 = vor.u32 %v3874_v24, %v3326_v26  ;;  %1896 = vmatpush.bf16.msrb.mxu0 %v3073_v25  ;;  %v3733_v11 = vld [vmem:[#allocation5 + $0x1d4] sm:$0xf0] }
  0x93   :  { %v3806_v29 = vld [vmem:[#allocation5 + $0x424] sm:$0xf]  ;;  %v3054_v30 = vld [vmem:[#allocation5 + $0x430] sm:$0xf0]  ;;  %v3457_v33 = vor.u32 %v3906_v27, %v3454_v28  ;;  %v2884_v14 = vld [vmem:[#allocation5 + $0x2c8] sm:$0xf]  ;;  %v2757_v21 = vor.u32 %v3733_v11, %v2756_v9 }
  0x94   :  { %v3838_v34 = vld [vmem:[#allocation5 + $0x524] sm:$0xf]  ;;  %v3182_v35 = vld [vmem:[#allocation5 + $0x530] sm:$0xf0]  ;;  %v3057_v39 = vor.u32 %v3806_v29, %v3054_v30  ;;  %1910 = vmatpush.bf16.msrb.mxu1 %v3201_v31  ;;  %v3765_v15 = vld [vmem:[#allocation5 + $0x2d4] sm:$0xf0] }
  0x95   :  { %v3870_v38 = vld [vmem:[#allocation5 + $0x624] sm:$0xf]  ;;  %v3310_v40 = vld [vmem:[#allocation5 + $0x630] sm:$0xf0]  ;;  %v3185_v47 = vor.u32 %v3838_v34, %v3182_v35  ;;  %1924 = vmatpush.bf16.msrb.mxu2 %v3329_v32  ;;  %v3012_v16 = vld [vmem:[#allocation5 + $0x3c8] sm:$0xf]  ;;  %v2885_v22 = vor.u32 %v3765_v15, %v2884_v14 }
  0x96   :  { %v3902_v43 = vld [vmem:[#allocation5 + $0x724] sm:$0xf]  ;;  %v3438_v44 = vld [vmem:[#allocation5 + $0x730] sm:$0xf0]  ;;  %1938 = vmatpush.bf16.msrb.mxu3 %v3457_v33  ;;  %v3313_v51 = vor.u32 %v3870_v38, %v3310_v40  ;;  %1897 = vmatpush.bf16.msrb.mxu0 %v3057_v39  ;;  %v3797_v17 = vld [vmem:[#allocation5 + $0x3d4] sm:$0xf0] }
  0x97   :  { %v3802_v45 = vld [vmem:[#allocation5 + $0x404] sm:$0xf]  ;;  %v3038_v46 = vld [vmem:[#allocation5 + $0x410] sm:$0xf0]  ;;  %v3441_v52 = vor.u32 %v3902_v43, %v3438_v44  ;;  %v2612_v23 = vld [vmem:[#allocation5 + $0xa8] sm:$0xf]  ;;  %v3013_v26 = vor.u32 %v3797_v17, %v3012_v16 }
  0x98   :  { %v3834_v48 = vld [vmem:[#allocation5 + $0x504] sm:$0xf]  ;;  %v3166_v53 = vld [vmem:[#allocation5 + $0x510] sm:$0xf0]  ;;  %v3041_v56 = vor.u32 %v3802_v45, %v3038_v46  ;;  %1911 = vmatpush.bf16.msrb.mxu1 %v3185_v47  ;;  %v3697_v24 = vld [vmem:[#allocation5 + $0xb4] sm:$0xf0] }
  0x99   :  { %v3866_v54 = vld [vmem:[#allocation5 + $0x604] sm:$0xf]  ;;  %v3294_v55 = vld [vmem:[#allocation5 + $0x610] sm:$0xf0]  ;;  %v3169_v0 = vor.u32 %v3834_v48, %v3166_v53  ;;  %1925 = vmatpush.bf16.msrb.mxu2 %v3313_v51  ;;  %v2740_v25 = vld [vmem:[#allocation5 + $0x1a8] sm:$0xf]  ;;  %v2613_v32 = vor.u32 %v3697_v24, %v2612_v23 }
  0x9a   :  { %v3898_v57 = vld [vmem:[#allocation5 + $0x704] sm:$0xf]  ;;  %v3422_v58 = vld [vmem:[#allocation5 + $0x710] sm:$0xf0]  ;;  %1939 = vmatpush.bf16.msrb.mxu3 %v3441_v52  ;;  %v3297_v3 = vor.u32 %v3866_v54, %v3294_v55  ;;  %1898 = vmatpush.bf16.msrb.mxu0 %v3041_v56  ;;  %v3729_v27 = vld [vmem:[#allocation5 + $0x1b4] sm:$0xf0] }
  0x9b   :  { %v3425_v4 = vor.u32 %v3898_v57, %v3422_v58  ;;  %v2868_v28 = vld [vmem:[#allocation5 + $0x2a8] sm:$0xf]  ;;  %v3761_v29 = vld [vmem:[#allocation5 + $0x2b4] sm:$0xf0]  ;;  %v2741_v34 = vor.u32 %v3729_v27, %v2740_v25 }
  0x9c   :  { %1912 = vmatpush.bf16.msrb.mxu1 %v3169_v0  ;;  %v2996_v30 = vld [vmem:[#allocation5 + $0x3a8] sm:$0xf]  ;;  %v3793_v31 = vld [vmem:[#allocation5 + $0x3b4] sm:$0xf0]  ;;  %v2869_v35 = vor.u32 %v3761_v29, %v2868_v28 }
  0x9d   :  { %1926 = vmatpush.bf16.msrb.mxu2 %v3297_v3  ;;  %1899 = vmatmul.bf16.vlgmr.msrb.gmra.mxu0 %v4175_v36  ;;  %v2596_v33 = vld [vmem:[#allocation5 + $0x88] sm:$0xf]  ;;  %v3693_v38 = vld [vmem:[#allocation5 + $0x94] sm:$0xf0]  ;;  %v2997_v43 = vor.u32 %v3793_v31, %v2996_v30 }
  0x9e   :  { %1947 = vmatpush.bf16.msra.mxu0 %v2645_v60  ;;  %1940 = vmatpush.bf16.msrb.mxu3 %v3425_v4  ;;  %v2724_v39 = vld [vmem:[#allocation5 + $0x188] sm:$0xf]  ;;  %v3725_v40 = vld [vmem:[#allocation5 + $0x194] sm:$0xf0]  ;;  %v2597_v48 = vor.u32 %v3693_v38, %v2596_v33 }
  0x9f   :  { %1913 = vmatmul.bf16.vlgmr.msrb.gmra.mxu1 %v4180_v41  ;;  %v2852_v44 = vld [vmem:[#allocation5 + $0x288] sm:$0xf]  ;;  %v3757_v45 = vld [vmem:[#allocation5 + $0x294] sm:$0xf0]  ;;  %v2725_v49 = vor.u32 %v3725_v40, %v2724_v39 }
  0xa0   :  { %1961 = vmatpush.bf16.msra.mxu1 %v2773_v5  ;;  %1927 = vmatmul.bf16.vlgmr.msrb.gmra.mxu2 %v4177_v37  ;;  %v2980_v46 = vld [vmem:[#allocation5 + $0x388] sm:$0xf]  ;;  %v3789_v47 = vld [vmem:[#allocation5 + $0x394] sm:$0xf0]  ;;  %v2853_v50 = vor.u32 %v3757_v45, %v2852_v44 }
  0xa1   :  { %1975 = vmatpush.bf16.msra.mxu2 %v2901_v6  ;;  %1941 = vmatmul.bf16.vlgmr.msrb.gmra.mxu3 %v4182_v42  ;;  %v2580_v51 = vld [vmem:[#allocation5 + $0x68] sm:$0xf]  ;;  %v3689_v52 = vld [vmem:[#allocation5 + $0x74] sm:$0xf0]  ;;  %v2981_v54 = vor.u32 %v3789_v47, %v2980_v46 }
  0xa2   :  { %1989 = vmatpush.bf16.msra.mxu3 %v3029_v10  ;;  %1948 = vmatpush.bf16.msra.mxu0 %v2629_v18  ;;  %v2708_v53 = vld [vmem:[#allocation5 + $0x168] sm:$0xf]  ;;  %v3721_v55 = vld [vmem:[#allocation5 + $0x174] sm:$0xf0]  ;;  %v2581_v60 = vor.u32 %v3689_v52, %v2580_v51 }
  0xa3   :  { %v2836_v56 = vld [vmem:[#allocation5 + $0x268] sm:$0xf]  ;;  %v3753_v57 = vld [vmem:[#allocation5 + $0x274] sm:$0xf0]  ;;  %v2709_v61 = vor.u32 %v3721_v55, %v2708_v53 }
  0xa4   :  { %1962 = vmatpush.bf16.msra.mxu1 %v2757_v21  ;;  %v2964_v58 = vld [vmem:[#allocation5 + $0x368] sm:$0xf]  ;;  %v3785_v59 = vld [vmem:[#allocation5 + $0x374] sm:$0xf0]  ;;  %v2837_v62 = vor.u32 %v3753_v57, %v2836_v56 }
  0xa5   :  { %1976 = vmatpush.bf16.msra.mxu2 %v2885_v22  ;;  %v2564_v63 = vld [vmem:[#allocation5 + $0x48] sm:$0xf]  ;;  %v3685_v0 = vld [vmem:[#allocation5 + $0x54] sm:$0xf0]  ;;  %v2965_v2 = vor.u32 %v3785_v59, %v2964_v58 }
  0xa6   :  { %1990 = vmatpush.bf16.msra.mxu3 %v3013_v26  ;;  %1949 = vmatpush.bf16.msra.mxu0 %v2613_v32  ;;  %v2692_v1 = vld [vmem:[#allocation5 + $0x148] sm:$0xf]  ;;  %v3717_v3 = vld [vmem:[#allocation5 + $0x154] sm:$0xf0]  ;;  %v2565_v8 = vor.u32 %v3685_v0, %v2564_v63 }
  0xa7   :  { %v2820_v4 = vld [vmem:[#allocation5 + $0x248] sm:$0xf]  ;;  %v3749_v5 = vld [vmem:[#allocation5 + $0x254] sm:$0xf0]  ;;  %v2693_v9 = vor.u32 %v3717_v3, %v2692_v1 }
  0xa8   :  { %1963 = vmatpush.bf16.msra.mxu1 %v2741_v34  ;;  %v2948_v6 = vld [vmem:[#allocation5 + $0x348] sm:$0xf]  ;;  %v3781_v7 = vld [vmem:[#allocation5 + $0x354] sm:$0xf0]  ;;  %v2821_v10 = vor.u32 %v3749_v5, %v2820_v4 }
  0xa9   :  { %1977 = vmatpush.bf16.msra.mxu2 %v2869_v35  ;;  %v2548_v11 = vld [vmem:[#allocation5 + $0x28] sm:$0xf]  ;;  %v3681_v14 = vld [vmem:[#allocation5 + $0x34] sm:$0xf0]  ;;  %v2949_v16 = vor.u32 %v3781_v7, %v2948_v6 }
  0xaa   :  { %1991 = vmatpush.bf16.msra.mxu3 %v2997_v43  ;;  %1950 = vmatpush.bf16.msra.mxu0 %v2597_v48  ;;  %v2676_v15 = vld [vmem:[#allocation5 + $0x128] sm:$0xf]  ;;  %v3713_v17 = vld [vmem:[#allocation5 + $0x134] sm:$0xf0]  ;;  %v2549_v24 = vor.u32 %v3681_v14, %v2548_v11 }
  0xab   :  { %v2804_v18 = vld [vmem:[#allocation5 + $0x228] sm:$0xf]  ;;  %v3745_v21 = vld [vmem:[#allocation5 + $0x234] sm:$0xf0]  ;;  %v2677_v27 = vor.u32 %v3713_v17, %v2676_v15 }
  0xac   :  { %1964 = vmatpush.bf16.msra.mxu1 %v2725_v49  ;;  %v2932_v22 = vld [vmem:[#allocation5 + $0x328] sm:$0xf]  ;;  %v3777_v23 = vld [vmem:[#allocation5 + $0x334] sm:$0xf0]  ;;  %v2805_v28 = vor.u32 %v3745_v21, %v2804_v18 }
  0xad   :  { %1978 = vmatpush.bf16.msra.mxu2 %v2853_v50  ;;  %v2532_v25 = vld [vmem:[#allocation5 + $0x8] sm:$0xf]  ;;  %v3677_v26 = vld [vmem:[#allocation5 + $0x14] sm:$0xf0]  ;;  %v2933_v32 = vor.u32 %v3777_v23, %v2932_v22 }
  0xae   :  { %1992 = vmatpush.bf16.msra.mxu3 %v2981_v54  ;;  %1951 = vmatpush.bf16.msra.mxu0 %v2581_v60  ;;  %v2660_v29 = vld [vmem:[#allocation5 + $0x108] sm:$0xf]  ;;  %v3709_v30 = vld [vmem:[#allocation5 + $0x114] sm:$0xf0]  ;;  %v2533_v43 = vor.u32 %v3677_v26, %v2532_v25 }
  0xaf   :  { %v2788_v31 = vld [vmem:[#allocation5 + $0x208] sm:$0xf]  ;;  %v3741_v33 = vld [vmem:[#allocation5 + $0x214] sm:$0xf0]  ;;  %v2661_v47 = vor.u32 %v3709_v30, %v2660_v29 }
  0xb0   :  { %1965 = vmatpush.bf16.msra.mxu1 %v2709_v61  ;;  %v2916_v34 = vld [vmem:[#allocation5 + $0x308] sm:$0xf]  ;;  %v3773_v35 = vld [vmem:[#allocation5 + $0x314] sm:$0xf0]  ;;  %v2789_v48 = vor.u32 %v3741_v33, %v2788_v31 }
  0xb1   :  { %1979 = vmatpush.bf16.msra.mxu2 %v2837_v62  ;;  %v3156_v38 = vld [vmem:[#allocation5 + $0x4e8] sm:$0xf]  ;;  %v3833_v39 = vld [vmem:[#allocation5 + $0x4f4] sm:$0xf0]  ;;  %v2917_v51 = vor.u32 %v3773_v35, %v2916_v34 }
  0xb2   :  { %1993 = vmatpush.bf16.msra.mxu3 %v2965_v2  ;;  %1952 = vmatpush.bf16.msra.mxu0 %v2565_v8  ;;  %v3284_v40 = vld [vmem:[#allocation5 + $0x5e8] sm:$0xf]  ;;  %v3865_v44 = vld [vmem:[#allocation5 + $0x5f4] sm:$0xf0]  ;;  %v3157_v52 = vor.u32 %v3833_v39, %v3156_v38 }
  0xb3   :  { %v3412_v45 = vld [vmem:[#allocation5 + $0x6e8] sm:$0xf]  ;;  %v3897_v46 = vld [vmem:[#allocation5 + $0x6f4] sm:$0xf0]  ;;  %v3285_v53 = vor.u32 %v3865_v44, %v3284_v40 }
  0xb4   :  { %1966 = vmatpush.bf16.msra.mxu1 %v2693_v9  ;;  %v3540_v49 = vld [vmem:[#allocation5 + $0x7e8] sm:$0xf]  ;;  %v3929_v50 = vld [vmem:[#allocation5 + $0x7f4] sm:$0xf0]  ;;  %v3413_v54 = vor.u32 %v3897_v46, %v3412_v45 }
  0xb5   :  { %1980 = vmatpush.bf16.msra.mxu2 %v2821_v10  ;;  %v3140_v55 = vld [vmem:[#allocation5 + $0x4c8] sm:$0xf]  ;;  %v3829_v56 = vld [vmem:[#allocation5 + $0x4d4] sm:$0xf0]  ;;  %v3541_v58 = vor.u32 %v3929_v50, %v3540_v49 }
  0xb6   :  { %1994 = vmatpush.bf16.msra.mxu3 %v2949_v16  ;;  %1953 = vmatpush.bf16.msra.mxu0 %v2549_v24  ;;  %v3268_v57 = vld [vmem:[#allocation5 + $0x5c8] sm:$0xf]  ;;  %v3861_v59 = vld [vmem:[#allocation5 + $0x5d4] sm:$0xf0]  ;;  %v3141_v0 = vor.u32 %v3829_v56, %v3140_v55 }
  0xb7   :  { %v3396_v60 = vld [vmem:[#allocation5 + $0x6c8] sm:$0xf]  ;;  %v3893_v61 = vld [vmem:[#allocation5 + $0x6d4] sm:$0xf0]  ;;  %v3269_v1 = vor.u32 %v3861_v59, %v3268_v57 }
  0xb8   :  { %1967 = vmatpush.bf16.msra.mxu1 %v2677_v27  ;;  %v3524_v62 = vld [vmem:[#allocation5 + $0x7c8] sm:$0xf]  ;;  %v3925_v63 = vld [vmem:[#allocation5 + $0x7d4] sm:$0xf0]  ;;  %v3397_v2 = vor.u32 %v3893_v61, %v3396_v60 }
  0xb9   :  { %1981 = vmatpush.bf16.msra.mxu2 %v2805_v28  ;;  %v3124_v3 = vld [vmem:[#allocation5 + $0x4a8] sm:$0xf]  ;;  %v3825_v4 = vld [vmem:[#allocation5 + $0x4b4] sm:$0xf0]  ;;  %v3525_v6 = vor.u32 %v3925_v63, %v3524_v62 }
  0xba   :  { %1995 = vmatpush.bf16.msra.mxu3 %v2933_v32  ;;  %1954 = vmatpush.bf16.msra.mxu0 %v2533_v43  ;;  %v3252_v5 = vld [vmem:[#allocation5 + $0x5a8] sm:$0xf]  ;;  %v3857_v7 = vld [vmem:[#allocation5 + $0x5b4] sm:$0xf0]  ;;  %v3125_v14 = vor.u32 %v3825_v4, %v3124_v3 }
  0xbb   :  { %v3380_v8 = vld [vmem:[#allocation5 + $0x6a8] sm:$0xf]  ;;  %v3889_v9 = vld [vmem:[#allocation5 + $0x6b4] sm:$0xf0]  ;;  %v3253_v15 = vor.u32 %v3857_v7, %v3252_v5 }
  0xbc   :  { %1968 = vmatpush.bf16.msra.mxu1 %v2661_v47  ;;  %v3508_v10 = vld [vmem:[#allocation5 + $0x7a8] sm:$0xf]  ;;  %v3921_v11 = vld [vmem:[#allocation5 + $0x7b4] sm:$0xf0]  ;;  %v3381_v16 = vor.u32 %v3889_v9, %v3380_v8 }
  0xbd   :  { %1982 = vmatpush.bf16.msra.mxu2 %v2789_v48  ;;  %1955 = vmatmul.bf16.vlgmr.msra.gmra.mxu0 %v4159_v12  ;;  %v3108_v17 = vld [vmem:[#allocation5 + $0x488] sm:$0xf]  ;;  %v3821_v18 = vld [vmem:[#allocation5 + $0x494] sm:$0xf0]  ;;  %v3509_v22 = vor.u32 %v3921_v11, %v3508_v10 }
  0xbe   :  { %1996 = vmatpush.bf16.msra.mxu3 %v2917_v51  ;;  %2003 = vmatpush.bf16.msrb.mxu0 %v3157_v52  ;;  %v3236_v21 = vld [vmem:[#allocation5 + $0x588] sm:$0xf]  ;;  %v3853_v23 = vld [vmem:[#allocation5 + $0x594] sm:$0xf0]  ;;  %v3109_v28 = vor.u32 %v3821_v18, %v3108_v17  ;;  %v3703_v18 = vld [vmem:[#allocation5 + $0xec] sm:$0xf] }
  0xbf   :  { %1969 = vmatmul.bf16.vlgmr.msra.gmra.mxu1 %v4164_v19  ;;  %v3364_v24 = vld [vmem:[#allocation5 + $0x688] sm:$0xf]  ;;  %v3885_v25 = vld [vmem:[#allocation5 + $0x694] sm:$0xf0]  ;;  %v3237_v29 = vor.u32 %v3853_v23, %v3236_v21  ;;  %v2646_v21 = vld [vmem:[#allocation5 + $0xf8] sm:$0xf0] }
  0xc0   :  { %2017 = vmatpush.bf16.msrb.mxu1 %v3285_v53  ;;  %1983 = vmatmul.bf16.vlgmr.msra.gmra.mxu2 %v4161_v13  ;;  %v3492_v26 = vld [vmem:[#allocation5 + $0x788] sm:$0xf]  ;;  %v3917_v27 = vld [vmem:[#allocation5 + $0x794] sm:$0xf0]  ;;  %v3365_v30 = vor.u32 %v3885_v25, %v3364_v24  ;;  %v2774_v24 = vld [vmem:[#allocation5 + $0x1f8] sm:$0xf0] }
  0xc1   :  { %2031 = vmatpush.bf16.msrb.mxu2 %v3413_v54  ;;  %1997 = vmatmul.bf16.vlgmr.msra.gmra.mxu3 %v4167_v20  ;;  %v3092_v31 = vld [vmem:[#allocation5 + $0x468] sm:$0xf]  ;;  %v3817_v32 = vld [vmem:[#allocation5 + $0x474] sm:$0xf0]  ;;  %v3493_v34 = vor.u32 %v3917_v27, %v3492_v26  ;;  %v3767_v25 = vld [vmem:[#allocation5 + $0x2ec] sm:$0xf] }
  0xc2   :  { %2045 = vmatpush.bf16.msrb.mxu3 %v3541_v58  ;;  %2004 = vmatpush.bf16.msrb.mxu0 %v3141_v0  ;;  %v3220_v33 = vld [vmem:[#allocation5 + $0x568] sm:$0xf]  ;;  %v3849_v35 = vld [vmem:[#allocation5 + $0x574] sm:$0xf0]  ;;  %v3093_v44 = vor.u32 %v3817_v32, %v3092_v31  ;;  %v2902_v26 = vld [vmem:[#allocation5 + $0x2f8] sm:$0xf0]  ;;  %v2649_v32 = vor.u32 %v3703_v18, %v2646_v21 }
  0xc3   :  { %v3348_v38 = vld [vmem:[#allocation5 + $0x668] sm:$0xf]  ;;  %v3881_v39 = vld [vmem:[#allocation5 + $0x674] sm:$0xf0]  ;;  %v3221_v45 = vor.u32 %v3849_v35, %v3220_v33  ;;  %v3699_v35 = vld [vmem:[#allocation5 + $0xcc] sm:$0xf] }
  0xc4   :  { %2018 = vmatpush.bf16.msrb.mxu1 %v3269_v1  ;;  %v3476_v40 = vld [vmem:[#allocation5 + $0x768] sm:$0xf]  ;;  %v3913_v43 = vld [vmem:[#allocation5 + $0x774] sm:$0xf0]  ;;  %v3349_v46 = vor.u32 %v3881_v39, %v3348_v38  ;;  %v2630_v38 = vld [vmem:[#allocation5 + $0xd8] sm:$0xf0] }
  0xc5   :  { %2032 = vmatpush.bf16.msrb.mxu2 %v3397_v2  ;;  %v3076_v47 = vld [vmem:[#allocation5 + $0x448] sm:$0xf]  ;;  %v3813_v48 = vld [vmem:[#allocation5 + $0x454] sm:$0xf0]  ;;  %v3477_v50 = vor.u32 %v3913_v43, %v3476_v40  ;;  %v3731_v39 = vld [vmem:[#allocation5 + $0x1cc] sm:$0xf] }
  0xc6   :  { %2046 = vmatpush.bf16.msrb.mxu3 %v3525_v6  ;;  %2005 = vmatpush.bf16.msrb.mxu0 %v3125_v14  ;;  %v3204_v49 = vld [vmem:[#allocation5 + $0x548] sm:$0xf]  ;;  %v3845_v51 = vld [vmem:[#allocation5 + $0x554] sm:$0xf0]  ;;  %v3077_v56 = vor.u32 %v3813_v48, %v3076_v47  ;;  %v2758_v43 = vld [vmem:[#allocation5 + $0x1d8] sm:$0xf0]  ;;  %v2633_v48 = vor.u32 %v3699_v35, %v2630_v38 }
  0xc7   :  { %v3332_v52 = vld [vmem:[#allocation5 + $0x648] sm:$0xf]  ;;  %v3877_v53 = vld [vmem:[#allocation5 + $0x654] sm:$0xf0]  ;;  %v3205_v57 = vor.u32 %v3845_v51, %v3204_v49  ;;  %v3014_v47 = vld [vmem:[#allocation5 + $0x3d8] sm:$0xf0]  ;;  %v2761_v49 = vor.u32 %v3731_v39, %v2758_v43 }
  0xc8   :  { %2019 = vmatpush.bf16.msrb.mxu1 %v3253_v15  ;;  %v3460_v54 = vld [vmem:[#allocation5 + $0x748] sm:$0xf]  ;;  %v3909_v55 = vld [vmem:[#allocation5 + $0x754] sm:$0xf0]  ;;  %v3333_v58 = vor.u32 %v3877_v53, %v3332_v52  ;;  %v3695_v51 = vld [vmem:[#allocation5 + $0xac] sm:$0xf] }
  0xc9   :  { %2033 = vmatpush.bf16.msrb.mxu2 %v3381_v16  ;;  %v3060_v59 = vld [vmem:[#allocation5 + $0x428] sm:$0xf]  ;;  %v3809_v60 = vld [vmem:[#allocation5 + $0x434] sm:$0xf0]  ;;  %v3461_v62 = vor.u32 %v3909_v55, %v3460_v54  ;;  %v2614_v52 = vld [vmem:[#allocation5 + $0xb8] sm:$0xf0] }
  0xca   :  { %2047 = vmatpush.bf16.msrb.mxu3 %v3509_v22  ;;  %2006 = vmatpush.bf16.msrb.mxu0 %v3109_v28  ;;  %v3188_v61 = vld [vmem:[#allocation5 + $0x528] sm:$0xf]  ;;  %v3841_v63 = vld [vmem:[#allocation5 + $0x534] sm:$0xf0]  ;;  %v3061_v4 = vor.u32 %v3809_v60, %v3060_v59  ;;  %v3735_v22 = vld [vmem:[#allocation5 + $0x1ec] sm:$0xf]  ;;  %v2617_v60 = vor.u32 %v3695_v51, %v2614_v52 }
  0xcb   :  { %v3316_v0 = vld [vmem:[#allocation5 + $0x628] sm:$0xf]  ;;  %v3873_v1 = vld [vmem:[#allocation5 + $0x634] sm:$0xf0]  ;;  %v3189_v7 = vor.u32 %v3841_v63, %v3188_v61  ;;  %v2777_v33 = vor.u32 %v3735_v22, %v2774_v24  ;;  %v3727_v53 = vld [vmem:[#allocation5 + $0x1ac] sm:$0xf] }
  0xcc   :  { %2020 = vmatpush.bf16.msrb.mxu1 %v3237_v29  ;;  %v3444_v2 = vld [vmem:[#allocation5 + $0x728] sm:$0xf]  ;;  %v3905_v3 = vld [vmem:[#allocation5 + $0x734] sm:$0xf0]  ;;  %v3317_v8 = vor.u32 %v3873_v1, %v3316_v0  ;;  %v3799_v29 = vld [vmem:[#allocation5 + $0x3ec] sm:$0xf] }
  0xcd   :  { %2034 = vmatpush.bf16.msrb.mxu2 %v3365_v30  ;;  %v3044_v5 = vld [vmem:[#allocation5 + $0x408] sm:$0xf]  ;;  %v3805_v6 = vld [vmem:[#allocation5 + $0x414] sm:$0xf0]  ;;  %v3445_v14 = vor.u32 %v3905_v3, %v3444_v2  ;;  %v3030_v30 = vld [vmem:[#allocation5 + $0x3f8] sm:$0xf0] }
  0xce   :  { %2048 = vmatpush.bf16.msrb.mxu3 %v3493_v34  ;;  %2007 = vmatpush.bf16.msrb.mxu0 %v3093_v44  ;;  %v3172_v9 = vld [vmem:[#allocation5 + $0x508] sm:$0xf]  ;;  %v3837_v10 = vld [vmem:[#allocation5 + $0x514] sm:$0xf0]  ;;  %v3045_v23 = vor.u32 %v3805_v6, %v3044_v5  ;;  %v2905_v34 = vor.u32 %v3767_v25, %v2902_v26  ;;  %v3033_v40 = vor.u32 %v3799_v29, %v3030_v30  ;;  %v3763_v44 = vld [vmem:[#allocation5 + $0x2cc] sm:$0xf] }
  0xcf   :  { %v3300_v11 = vld [vmem:[#allocation5 + $0x608] sm:$0xf]  ;;  %v3869_v15 = vld [vmem:[#allocation5 + $0x614] sm:$0xf0]  ;;  %v3173_v27 = vor.u32 %v3837_v10, %v3172_v9  ;;  %v2742_v55 = vld [vmem:[#allocation5 + $0x1b8] sm:$0xf0] }
  0xd0   :  { %2021 = vmatpush.bf16.msrb.mxu1 %v3221_v45  ;;  %v3428_v16 = vld [vmem:[#allocation5 + $0x708] sm:$0xf]  ;;  %v3901_v17 = vld [vmem:[#allocation5 + $0x714] sm:$0xf0]  ;;  %v3301_v28 = vor.u32 %v3869_v15, %v3300_v11  ;;  %v2886_v45 = vld [vmem:[#allocation5 + $0x2d8] sm:$0xf0]  ;;  %v2745_v61 = vor.u32 %v3727_v53, %v2742_v55 }
  0xd1   :  { %2035 = vmatpush.bf16.msrb.mxu2 %v3349_v46  ;;  %v3429_v31 = vor.u32 %v3901_v17, %v3428_v16  ;;  %v3795_v46 = vld [vmem:[#allocation5 + $0x3cc] sm:$0xf]  ;;  %v2998_v59 = vld [vmem:[#allocation5 + $0x3b8] sm:$0xf0] }
  0xd2   :  { %2049 = vmatpush.bf16.msrb.mxu3 %v3477_v50  ;;  %2008 = vmatpush.bf16.msrb.mxu0 %v3077_v56  ;;  %v2889_v50 = vor.u32 %v3763_v44, %v2886_v45  ;;  %v3017_v54 = vor.u32 %v3795_v46, %v3014_v47  ;;  %v3759_v56 = vld [vmem:[#allocation5 + $0x2ac] sm:$0xf]  ;;  %v2598_v0 = vld [vmem:[#allocation5 + $0x98] sm:$0xf0] }
  0xd3   :  { %v3691_v63 = vld [vmem:[#allocation5 + $0x8c] sm:$0xf]  ;;  %v2726_v3 = vld [vmem:[#allocation5 + $0x198] sm:$0xf0] }
  0xd4   :  { %2022 = vmatpush.bf16.msrb.mxu1 %v3205_v57  ;;  %v2870_v57 = vld [vmem:[#allocation5 + $0x2b8] sm:$0xf0]  ;;  %v3723_v1 = vld [vmem:[#allocation5 + $0x18c] sm:$0xf] }
  0xd5   :  { %2036 = vmatpush.bf16.msrb.mxu2 %v3333_v58  ;;  %v3791_v58 = vld [vmem:[#allocation5 + $0x3ac] sm:$0xf]  ;;  %v2854_v5 = vld [vmem:[#allocation5 + $0x298] sm:$0xf0]  ;;  %v2729_v10 = vor.u32 %v3723_v1, %v2726_v3 }
  0xd6   :  { %2050 = vmatpush.bf16.msrb.mxu3 %v3461_v62  ;;  %2009 = vmatpush.bf16.msrb.mxu0 %v3061_v4  ;;  %v2873_v62 = vor.u32 %v3759_v56, %v2870_v57  ;;  %v3001_v2 = vor.u32 %v3791_v58, %v2998_v59  ;;  %v3755_v4 = vld [vmem:[#allocation5 + $0x28c] sm:$0xf]  ;;  %v2582_v15 = vld [vmem:[#allocation5 + $0x78] sm:$0xf0] }
  0xd7   :  { %v3787_v6 = vld [vmem:[#allocation5 + $0x38c] sm:$0xf]  ;;  %v2857_v11 = vor.u32 %v3755_v4, %v2854_v5  ;;  %v2710_v21 = vld [vmem:[#allocation5 + $0x178] sm:$0xf0] }
  0xd8   :  { %2023 = vmatpush.bf16.msrb.mxu1 %v3189_v7  ;;  %v2982_v7 = vld [vmem:[#allocation5 + $0x398] sm:$0xf0]  ;;  %v4204_v9 = vpop.f32.mrf.mxu0  ;;  %v3719_v16 = vld [vmem:[#allocation5 + $0x16c] sm:$0xf] }
  0xd9   :  { %2037 = vmatpush.bf16.msrb.mxu2 %v3317_v8  ;;  %v2601_v8 = vor.u32 %v3691_v63, %v2598_v0  ;;  %v2985_v18 = vor.u32 %v3787_v6, %v2982_v7  ;;  %v3751_v22 = vld [vmem:[#allocation5 + $0x26c] sm:$0xf]  ;;  %v2966_v25 = vld [vmem:[#allocation5 + $0x378] sm:$0xf0] }
  0xda   :  { %2051 = vmatpush.bf16.msrb.mxu3 %v3445_v14  ;;  %2010 = vmatpush.bf16.msrb.mxu0 %v3045_v23  ;;  %v3687_v14 = vld [vmem:[#allocation5 + $0x6c] sm:$0xf]  ;;  %v4206_v17 = vpop.f32.mrf.mxu1  ;;  %v2838_v23 = vld [vmem:[#allocation5 + $0x278] sm:$0xf0] }
  0xdb   :  { %v3783_v24 = vld [vmem:[#allocation5 + $0x36c] sm:$0xf]  ;;  %v2585_v26 = vor.u32 %v3687_v14, %v2582_v15  ;;  %v2566_v30 = vld [vmem:[#allocation5 + $0x58] sm:$0xf0] }
  0xdc   :  { %2024 = vmatpush.bf16.msrb.mxu1 %v3173_v27  ;;  %v2713_v27 = vor.u32 %v3719_v16, %v2710_v21  ;;  %v3683_v29 = vld [vmem:[#allocation5 + $0x4c] sm:$0xf]  ;;  %v2822_v35 = vld [vmem:[#allocation5 + $0x258] sm:$0xf0] }
  0xdd   :  { %2038 = vmatpush.bf16.msrb.mxu2 %v3301_v28  ;;  %2011 = vmatmul.bf16.vlgmr.msrb.gmra.mxu0 %v4175_v36  ;;  %v2841_v28 = vor.u32 %v3751_v22, %v2838_v23  ;;  %v3779_v38 = vld [vmem:[#allocation5 + $0x34c] sm:$0xf]  ;;  %v2950_v39 = vld [vmem:[#allocation5 + $0x358] sm:$0xf0]  ;;  %v2569_v43 = vor.u32 %v3683_v29, %v2566_v30 }
  0xde   :  { %2052 = vmatpush.bf16.msrb.mxu3 %v3429_v31  ;;  %2059 = vmatpush.bf16.msra.mxu0 %v2649_v32  ;;  %v3715_v31 = vld [vmem:[#allocation5 + $0x14c] sm:$0xf]  ;;  %v2969_v32 = vor.u32 %v3783_v24, %v2966_v25  ;;  %v2678_v51 = vld [vmem:[#allocation5 + $0x138] sm:$0xf0] }
  0xdf   :  { %2025 = vmatmul.bf16.vlgmr.msrb.gmra.mxu1 %v4180_v41  ;;  %v3679_v47 = vld [vmem:[#allocation5 + $0x2c] sm:$0xf]  ;;  %v2806_v53 = vld [vmem:[#allocation5 + $0x238] sm:$0xf0] }
  0xe0   :  { %2073 = vmatpush.bf16.msra.mxu1 %v2777_v33  ;;  %2039 = vmatmul.bf16.vlgmr.msrb.gmra.mxu2 %v4177_v37  ;;  %v2694_v33 = vld [vmem:[#allocation5 + $0x158] sm:$0xf0]  ;;  %v4210_v44 = vpop.f32.mrf.mxu3  ;;  %v3743_v52 = vld [vmem:[#allocation5 + $0x22c] sm:$0xf] }
  0xe1   :  { %2087 = vmatpush.bf16.msra.mxu2 %v2905_v34  ;;  %2053 = vmatmul.bf16.vlgmr.msrb.gmra.mxu3 %v4182_v42  ;;  %v3747_v34 = vld [vmem:[#allocation5 + $0x24c] sm:$0xf]  ;;  %v2697_v45 = vor.u32 %v3715_v31, %v2694_v33  ;;  %v2934_v56 = vld [vmem:[#allocation5 + $0x338] sm:$0xf0] }
  0xe2   :  { %2101 = vmatpush.bf16.msra.mxu3 %v3033_v40  ;;  %2060 = vmatpush.bf16.msra.mxu0 %v2633_v48  ;;  %v4208_v40 = vpop.f32.mrf.mxu2  ;;  %v2825_v46 = vor.u32 %v3747_v34, %v2822_v35  ;;  %v2550_v48 = vld [vmem:[#allocation5 + $0x38] sm:$0xf0]  ;;  %v3775_v55 = vld [vmem:[#allocation5 + $0x32c] sm:$0xf]  ;;  %v4214_v57 = vpop.f32.mrf.mxu1 }
  0xe3   :  { %v2553_v58 = vor.u32 %v3679_v47, %v2550_v48  ;;  %v3675_v59 = vld [vmem:[#allocation5 + $0xc] sm:$0xf]  ;;  %v2662_v0 = vld [vmem:[#allocation5 + $0x118] sm:$0xf0] }
  0xe4   :  { %2074 = vmatpush.bf16.msra.mxu1 %v2761_v49  ;;  %v3711_v49 = vld [vmem:[#allocation5 + $0x12c] sm:$0xf]  ;;  %v2790_v3 = vld [vmem:[#allocation5 + $0x218] sm:$0xf0] }
  0xe5   :  { %2088 = vmatpush.bf16.msra.mxu2 %v2889_v50  ;;  %v2953_v50 = vor.u32 %v3779_v38, %v2950_v39  ;;  %v3707_v63 = vld [vmem:[#allocation5 + $0x10c] sm:$0xf]  ;;  %v2918_v5 = vld [vmem:[#allocation5 + $0x318] sm:$0xf0] }
  0xe6   :  { %2102 = vmatpush.bf16.msra.mxu3 %v3017_v54  ;;  %2061 = vmatpush.bf16.msra.mxu0 %v2617_v60  ;;  %v4212_v54 = vpop.f32.mrf.mxu0  ;;  %v2534_v60 = vld [vmem:[#allocation5 + $0x18] sm:$0xf0]  ;;  %v3739_v1 = vld [vmem:[#allocation5 + $0x20c] sm:$0xf]  ;;  %v2665_v16 = vor.u32 %v3707_v63, %v2662_v0 }
  0xe7   :  { %v3771_v4 = vld [vmem:[#allocation5 + $0x30c] sm:$0xf]  ;;  %v3158_v7 = vld [vmem:[#allocation5 + $0x4f8] sm:$0xf0] }
  0xe8   :  { %2075 = vmatpush.bf16.msra.mxu1 %v2745_v61  ;;  %v2681_v61 = vor.u32 %v3711_v49, %v2678_v51  ;;  %v3831_v6 = vld [vmem:[#allocation5 + $0x4ec] sm:$0xf]  ;;  %v3414_v15 = vld [vmem:[#allocation5 + $0x6f8] sm:$0xf0]  ;;  %v2921_v24 = vor.u32 %v3771_v4, %v2918_v5 }
  0xe9   :  { %2089 = vmatpush.bf16.msra.mxu2 %v2873_v62  ;;  %v2809_v62 = vor.u32 %v3743_v52, %v2806_v53  ;;  %v3895_v14 = vld [vmem:[#allocation5 + $0x6ec] sm:$0xf]  ;;  %v3542_v22 = vld [vmem:[#allocation5 + $0x7f8] sm:$0xf0]  ;;  %v3161_v25 = vor.u32 %v3831_v6, %v3158_v7 }
  0xea   :  { %2103 = vmatpush.bf16.msra.mxu3 %v3001_v2  ;;  %2062 = vmatpush.bf16.msra.mxu0 %v2601_v8  ;;  %v2937_v2 = vor.u32 %v3775_v55, %v2934_v56  ;;  %v3863_v8 = vld [vmem:[#allocation5 + $0x5ec] sm:$0xf]  ;;  %v4216_v23 = vpop.f32.mrf.mxu2  ;;  %v3142_v30 = vld [vmem:[#allocation5 + $0x4d8] sm:$0xf0] }
  0xeb   :  { %v3927_v21 = vld [vmem:[#allocation5 + $0x7ec] sm:$0xf]  ;;  %v3270_v33 = vld [vmem:[#allocation5 + $0x5d8] sm:$0xf0] }
  0xec   :  { %2076 = vmatpush.bf16.msra.mxu1 %v2729_v10  ;;  %v2537_v10 = vor.u32 %v3675_v59, %v2534_v60  ;;  %v3827_v29 = vld [vmem:[#allocation5 + $0x4cc] sm:$0xf]  ;;  %v3398_v35 = vld [vmem:[#allocation5 + $0x6d8] sm:$0xf0] }
  0xed   :  { %2090 = vmatpush.bf16.msra.mxu2 %v2857_v11  ;;  %v3286_v11 = vld [vmem:[#allocation5 + $0x5f8] sm:$0xf0]  ;;  %v3859_v31 = vld [vmem:[#allocation5 + $0x5cc] sm:$0xf] }
  0xee   :  { %2104 = vmatpush.bf16.msra.mxu3 %v2985_v18  ;;  %2063 = vmatpush.bf16.msra.mxu0 %v2585_v26  ;;  %v2793_v18 = vor.u32 %v3739_v1, %v2790_v3  ;;  %v4218_v26 = vpop.f32.mrf.mxu3  ;;  %v3891_v34 = vld [vmem:[#allocation5 + $0x6cc] sm:$0xf]  ;;  %v4220_v38 = vpop.f32.mrf.mxu0  ;;  %v3273_v47 = vor.u32 %v3859_v31, %v3270_v33  ;;  %v3254_v53 = vld [vmem:[#allocation5 + $0x5b8] sm:$0xf0] }
  0xef   :  { %v3923_v39 = vld [vmem:[#allocation5 + $0x7cc] sm:$0xf]  ;;  %v3401_v48 = vor.u32 %v3891_v34, %v3398_v35  ;;  %v3382_v56 = vld [vmem:[#allocation5 + $0x6b8] sm:$0xf0] }
  0xf0   :  { %2077 = vmatpush.bf16.msra.mxu1 %v2713_v27  ;;  %v3289_v27 = vor.u32 %v3863_v8, %v3286_v11  ;;  %v3823_v49 = vld [vmem:[#allocation5 + $0x4ac] sm:$0xf]  ;;  %v3510_v59 = vld [vmem:[#allocation5 + $0x7b8] sm:$0xf0] }
  0xf1   :  { %2091 = vmatpush.bf16.msra.mxu2 %v2841_v28  ;;  %v3417_v28 = vor.u32 %v3895_v14, %v3414_v15  ;;  %v3855_v51 = vld [vmem:[#allocation5 + $0x5ac] sm:$0xf]  ;;  %v3110_v0 = vld [vmem:[#allocation5 + $0x498] sm:$0xf0] }
  0xf2   :  { %2105 = vmatpush.bf16.msra.mxu3 %v2969_v32  ;;  %2064 = vmatpush.bf16.msra.mxu0 %v2569_v43  ;;  %v3545_v32 = vor.u32 %v3927_v21, %v3542_v22  ;;  %v3526_v43 = vld [vmem:[#allocation5 + $0x7d8] sm:$0xf0]  ;;  %v3887_v55 = vld [vmem:[#allocation5 + $0x6ac] sm:$0xf] }
  0xf3   :  { %v3529_v52 = vor.u32 %v3923_v39, %v3526_v43  ;;  %v3819_v63 = vld [vmem:[#allocation5 + $0x48c] sm:$0xf]  ;;  %v3238_v3 = vld [vmem:[#allocation5 + $0x598] sm:$0xf0] }
  0xf4   :  { %2078 = vmatpush.bf16.msra.mxu1 %v2697_v45  ;;  %v4222_v45 = vpop.f32.mrf.mxu1  ;;  %v4228_v1 = vpop.f32.mrf.mxu2  ;;  %v3883_v4 = vld [vmem:[#allocation5 + $0x68c] sm:$0xf]  ;;  %v3494_v6 = vld [vmem:[#allocation5 + $0x798] sm:$0xf0] }
  0xf5   :  { %2092 = vmatpush.bf16.msra.mxu2 %v2825_v46  ;;  %v3145_v46 = vor.u32 %v3827_v29, %v3142_v30  ;;  %v3815_v11 = vld [vmem:[#allocation5 + $0x46c] sm:$0xf]  ;;  %v3094_v14 = vld [vmem:[#allocation5 + $0x478] sm:$0xf0] }
  0xf6   :  { %2106 = vmatpush.bf16.msra.mxu3 %v2953_v50  ;;  %2065 = vmatpush.bf16.msra.mxu0 %v2553_v58  ;;  %v3126_v50 = vld [vmem:[#allocation5 + $0x4b8] sm:$0xf0]  ;;  %v3919_v58 = vld [vmem:[#allocation5 + $0x7ac] sm:$0xf]  ;;  %v4230_v5 = vpop.f32.mrf.mxu3  ;;  %v4232_v7 = vpop.f32.mrf.mxu0 }
  0xf7   :  { %v3129_v60 = vor.u32 %v3823_v49, %v3126_v50  ;;  %v3847_v15 = vld [vmem:[#allocation5 + $0x56c] sm:$0xf]  ;;  %v3222_v21 = vld [vmem:[#allocation5 + $0x578] sm:$0xf0] }
  0xf8   :  { %2079 = vmatpush.bf16.msra.mxu1 %v2681_v61  ;;  %v3257_v61 = vor.u32 %v3855_v51, %v3254_v53  ;;  %v3879_v22 = vld [vmem:[#allocation5 + $0x66c] sm:$0xf]  ;;  %v3225_v29 = vor.u32 %v3847_v15, %v3222_v21  ;;  %v3206_v35 = vld [vmem:[#allocation5 + $0x558] sm:$0xf0] }
  0xf9   :  { %2093 = vmatpush.bf16.msra.mxu2 %v2809_v62  ;;  %v3385_v62 = vor.u32 %v3887_v55, %v3382_v56  ;;  %v3811_v31 = vld [vmem:[#allocation5 + $0x44c] sm:$0xf]  ;;  %v3334_v43 = vld [vmem:[#allocation5 + $0x658] sm:$0xf0] }
  0xfa   :  { %2107 = vmatpush.bf16.msra.mxu3 %v2937_v2  ;;  %2066 = vmatpush.bf16.msra.mxu0 %v2537_v10  ;;  %v3513_v2 = vor.u32 %v3919_v58, %v3510_v59  ;;  %v3843_v33 = vld [vmem:[#allocation5 + $0x54c] sm:$0xf]  ;;  %v3062_v58 = vld [vmem:[#allocation5 + $0x438] sm:$0xf0] }
  0xfb   :  { %v3875_v39 = vld [vmem:[#allocation5 + $0x64c] sm:$0xf] }
  0xfc   :  { %2080 = vmatpush.bf16.msra.mxu1 %v2665_v16  ;;  %v4234_v16 = vpop.f32.mrf.mxu1  ;;  %v4238_v49 = vpop.f32.mrf.mxu2  ;;  %v3337_v53 = vor.u32 %v3875_v39, %v3334_v43  ;;  %v3807_v56 = vld [vmem:[#allocation5 + $0x42c] sm:$0xf]  ;;  %v3945_v39 = vld [vmem:[#allocation8 + $0x78] sm:$0xff] }
  0xfd   :  { %2094 = vmatpush.bf16.msra.mxu2 %v2793_v18  ;;  %2067 = vmatmul.bf16.vlgmr.msra.gmra.mxu0 %v4159_v12  ;;  %v3366_v12 = vld [vmem:[#allocation5 + $0x698] sm:$0xf0]  ;;  %v3839_v59 = vld [vmem:[#allocation5 + $0x52c] sm:$0xf] }
  0xfe   :  { %2108 = vmatpush.bf16.msra.mxu3 %v2921_v24  ;;  %2115 = vmatpush.bf16.msrb.mxu0 %v3161_v25  ;;  %v3369_v10 = vor.u32 %v3883_v4, %v3366_v12  ;;  %v3350_v24 = vld [vmem:[#allocation5 + $0x678] sm:$0xf0]  ;;  %v3911_v25 = vld [vmem:[#allocation5 + $0x76c] sm:$0xf]  ;;  %v4240_v51 = vpop.f32.mrf.mxu3  ;;  %v1844_v55 = vpop.f32.mrf.mxu0  ;;  %v3065_v12 = vor.u32 %v3807_v56, %v3062_v58 }
  0xff   :  { %2081 = vmatmul.bf16.vlgmr.msra.gmra.mxu1 %v4164_v19  ;;  %v3113_v19 = vor.u32 %v3819_v63, %v3110_v0  ;;  %v3353_v30 = vor.u32 %v3879_v22, %v3350_v24  ;;  %v3318_v63 = vld [vmem:[#allocation5 + $0x638] sm:$0xf0]  ;;  %v3867_v15 = vld [vmem:[#allocation5 + $0x60c] sm:$0xf] }
 0x100   :  { %2129 = vmatpush.bf16.msrb.mxu1 %v3289_v27  ;;  %2095 = vmatmul.bf16.vlgmr.msra.gmra.mxu2 %v4161_v13  ;;  %v3851_v13 = vld [vmem:[#allocation5 + $0x58c] sm:$0xf]  ;;  %v3478_v27 = vld [vmem:[#allocation5 + $0x778] sm:$0xf0] }
 0x101   :  { %2143 = vmatpush.bf16.msrb.mxu2 %v3417_v28  ;;  %2109 = vmatmul.bf16.vlgmr.msra.gmra.mxu3 %v4167_v20  ;;  %v3915_v20 = vld [vmem:[#allocation5 + $0x78c] sm:$0xf]  ;;  %v3241_v8 = vor.u32 %v3851_v13, %v3238_v3  ;;  %v3097_v28 = vor.u32 %v3815_v11, %v3094_v14  ;;  %v3481_v34 = vor.u32 %v3911_v25, %v3478_v27  ;;  %v3174_v14 = vld [vmem:[#allocation5 + $0x518] sm:$0xf0] }
 0x102   :  { %2157 = vmatpush.bf16.msrb.mxu3 %v3545_v32  ;;  %2116 = vmatpush.bf16.msrb.mxu0 %v3145_v46  ;;  %v3497_v18 = vor.u32 %v3915_v20, %v3494_v6  ;;  %v3078_v32 = vld [vmem:[#allocation5 + $0x458] sm:$0xf0]  ;;  %v3907_v46 = vld [vmem:[#allocation5 + $0x74c] sm:$0xf] }
 0x103   :  { %v3081_v50 = vor.u32 %v3811_v31, %v3078_v32  ;;  %v3903_v13 = vld [vmem:[#allocation5 + $0x72c] sm:$0xf]  ;;  %v3430_v22 = vld [vmem:[#allocation5 + $0x718] sm:$0xf0] }
 0x104   :  { %2130 = vmatpush.bf16.msrb.mxu1 %v3273_v47  ;;  %v3462_v47 = vld [vmem:[#allocation5 + $0x758] sm:$0xf0]  ;;  %v1858_v0 = vpop.f32.mrf.mxu1  ;;  %v3899_v21 = vld [vmem:[#allocation5 + $0x70c] sm:$0xf] }
 0x105   :  { %2144 = vmatpush.bf16.msrb.mxu2 %v3401_v48  ;;  %v4236_v48 = vld [vmem:[#allocation7] sm:$0xf] }
 0x106   :  { %2158 = vmatpush.bf16.msrb.mxu3 %v3529_v52  ;;  %2117 = vmatpush.bf16.msrb.mxu0 %v3129_v60  ;;  %v3209_v52 = vor.u32 %v3843_v33, %v3206_v35  ;;  %v3465_v60 = vor.u32 %v3907_v46, %v3462_v47  ;;  %v435_v3 = vperm.slane %v4236_v48, 0  ;;  %v436_v4 = vperm.slane %v4236_v48, 1  ;;  %v1846_v35 = vpop.f32.mrf.mxu0  ;;  %v3936_v47 = vld [vmem:[#allocation8 + $0x30] sm:$0xff] }
 0x107   :  { %v1886_v32 = vpop.f32.mrf.mxu3  ;;  %v3433_v33 = vor.u32 %v3899_v21, %v3430_v22 }
 0x108   :  { %2131 = vmatpush.bf16.msrb.mxu1 %v3257_v61  ;;  %v3190_v61 = vld [vmem:[#allocation5 + $0x538] sm:$0xf0]  ;;  %v1733_v24 = vadd.f32 %v4204_v9, %v435_v3  ;;  %v1735_v25 = vadd.f32 %v4212_v54, %v435_v3 }
 0x109   :  { %2145 = vmatpush.bf16.msrb.mxu2 %v3385_v62  ;;  %v3871_v62 = vld [vmem:[#allocation5 + $0x62c] sm:$0xf]  ;;  %v3193_v20 = vor.u32 %v3839_v59, %v3190_v61 }
 0x10a   :  { %2159 = vmatpush.bf16.msrb.mxu3 %v3513_v2  ;;  %2118 = vmatpush.bf16.msrb.mxu0 %v3113_v19  ;;  %v3446_v2 = vld [vmem:[#allocation5 + $0x738] sm:$0xf0]  ;;  %v3321_v6 = vor.u32 %v3871_v62, %v3318_v63  ;;  %v3803_v19 = vld [vmem:[#allocation5 + $0x40c] sm:$0xf]  ;;  %v1747_v9 = vadd.f32 %v4206_v17, %v1733_v24  ;;  %v1749_v54 = vadd.f32 %v4214_v57, %v1735_v25  ;;  %v3942_v63 = vld [vmem:[#allocation8 + $0x60] sm:$0xff] }
 0x10b   :  { %v3449_v11 = vor.u32 %v3903_v13, %v3446_v2  ;;  %v3943_v59 = vld [vmem:[#allocation8 + $0x68] sm:$0xff]  ;;  %v3933_v2 = vld [vmem:[#allocation8 + $0x18] sm:$0xff] }
 0x10c   :  { %2132 = vmatpush.bf16.msrb.mxu1 %v3241_v8  ;;  %v3046_v8 = vld [vmem:[#allocation5 + $0x418] sm:$0xf0]  ;;  %v1860_v43 = vpop.f32.mrf.mxu1  ;;  %v1763_v17 = vadd.f32 %v4216_v23, %v1749_v54  ;;  %v3939_v24 = vld [vmem:[#allocation8 + $0x48] sm:$0xff] }
 0x10d   :  { %2146 = vmatpush.bf16.msrb.mxu2 %v3369_v10  ;;  %v3835_v10 = vld [vmem:[#allocation5 + $0x50c] sm:$0xf]  ;;  %v3049_v27 = vor.u32 %v3803_v19, %v3046_v8  ;;  %v3953_v8 = vld [vmem:[#allocation8 + $0xb8] sm:$0xff] }
 0x10e   :  { %2160 = vmatpush.bf16.msrb.mxu3 %v3497_v18  ;;  %2119 = vmatpush.bf16.msrb.mxu0 %v3097_v28  ;;  %v3302_v18 = vld [vmem:[#allocation5 + $0x618] sm:$0xf0]  ;;  %v1872_v28 = vpop.f32.mrf.mxu2 }
 0x10f   :  { %v3305_v31 = vor.u32 %v3867_v15, %v3302_v18  ;;  %v3949_v54 = vld [vmem:[#allocation8 + $0x98] sm:$0xff] }
 0x110   :  { %2133 = vmatpush.bf16.msrb.mxu1 %v3225_v29  ;;  %v1845_v29 = vadd.f32 %v1844_v55, %v436_v4  ;;  %v3935_v55 = vld [vmem:[#allocation8 + $0x28] sm:$0xff] }
 0x111   :  { %2147 = vmatpush.bf16.msrb.mxu2 %v3353_v30  ;;  %v3177_v30 = vor.u32 %v3835_v10, %v3174_v14  ;;  %v3932_v10 = vld [vmem:[#allocation8 + $0x10] sm:$0xff] }
 0x112   :  { %2161 = vmatpush.bf16.msrb.mxu3 %v3481_v34  ;;  %2120 = vmatpush.bf16.msrb.mxu0 %v3081_v50  ;;  %v3937_v34 = vld [vmem:[#allocation8 + $0x38] sm:$0xff]  ;;  %v1859_v46 = vadd.f32 %v1858_v0, %v1845_v29  ;;  %v1847_v50 = vadd.f32 %v1846_v35, %v436_v4  ;;  %v3952_v14 = vld [vmem:[#allocation8 + $0xb0] sm:$0xff] }
 0x114   :  { %2134 = vmatpush.bf16.msrb.mxu1 %v3209_v52  ;;  %v3944_v52 = vld [vmem:[#allocation8 + $0x70] sm:$0xff]  ;;  %v1873_v57 = vadd.f32 %v1872_v28, %v1859_v46  ;;  %v1861_v58 = vadd.f32 %v1860_v43, %v1847_v50  ;;  %v3951_v43 = vld [vmem:[#allocation8 + $0xa8] sm:$0xff]  ;;  %v437_v50 = vperm.slane %v4236_v48, 2 }
 0x115   :  { %2148 = vmatpush.bf16.msrb.mxu2 %v3337_v53  ;;  %v1761_v53 = vadd.f32 %v4208_v40, %v1747_v9  ;;  %v3934_v40 = vld [vmem:[#allocation8 + $0x20] sm:$0xff] }
 0x116   :  { %2162 = vmatpush.bf16.msrb.mxu3 %v3465_v60  ;;  %2121 = vmatpush.bf16.msrb.mxu0 %v3065_v12  ;;  %v1874_v56 = vpop.f32.mrf.mxu2  ;;  %v1887_v61 = vadd.f32 %v1886_v32, %v1873_v57 }
 0x117   :  { %v1775_v60 = vadd.f32 %v4210_v44, %v1761_v53  ;;  %v1875_v23 = vadd.f32 %v1874_v56, %v1861_v58  ;;  %v3941_v44 = vld [vmem:[#allocation8 + $0x58] sm:$0xff] }
 0x118   :  { %2135 = vmatpush.bf16.msrb.mxu1 %v3193_v20 }
 0x119   :  { %2149 = vmatpush.bf16.msrb.mxu2 %v3321_v6 }
 0x11a   :  { %2163 = vmatpush.bf16.msrb.mxu3 %v3449_v11  ;;  %2122 = vmatpush.bf16.msrb.mxu0 %v3049_v27  ;;  %v3940_v11 = vld [vmem:[#allocation8 + $0x50] sm:$0xff] }
 0x11c   :  { %2136 = vmatpush.bf16.msrb.mxu1 %v3177_v30  ;;  %v1914_v62 = vpop.f32.mrf.mxu1  ;;  %v3930_v30 = vld [vmem:[#allocation8] sm:$0xff] }
 0x11d   :  { %2150 = vmatpush.bf16.msrb.mxu2 %v3305_v31  ;;  %2123 = vmatmul.bf16.vlgmr.msrb.gmra.mxu0 %v4175_v36  ;;  %v1888_v36 = vpop.f32.mrf.mxu3 }
 0x11e   :  { %2164 = vmatpush.bf16.msrb.mxu3 %v3433_v33  ;;  %2443 = vmatpush.bf16.msra.mxu0 %v3937_v34  ;;  %v1889_v3 = vadd.f32 %v1888_v36, %v1875_v23  ;;  %v3946_v36 = vld [vmem:[#allocation8 + $0x80] sm:$0xff] }
 0x11f   :  { %2137 = vmatmul.bf16.vlgmr.msrb.gmra.mxu1 %v4180_v41  ;;  %v1777_v41 = vadd.f32 %v4218_v26, %v1763_v17 }
 0x120   :  { %2457 = vmatpush.bf16.msra.mxu1 %v3945_v39  ;;  %2151 = vmatmul.bf16.vlgmr.msrb.gmra.mxu2 %v4177_v37  ;;  %v1900_v37 = vpop.f32.mrf.mxu0 }
 0x121   :  { %2165 = vmatmul.bf16.vlgmr.msrb.gmra.mxu3 %v4182_v42  ;;  %v1789_v42 = vadd.f32 %v4220_v38, %v1775_v60  ;;  %v1791_v0 = vadd.f32 %v4232_v7, %v1777_v41  ;;  %v1901_v13 = vadd.f32 %v1900_v37, %v1887_v61  ;;  %2471 = vmatpush.bf16.msra.mxu2 %v3953_v8 }
 0x122   :  { %2444 = vmatpush.bf16.msra.mxu0 %v3936_v47  ;;  %v3948_v47 = vld [vmem:[#allocation8 + $0x90] sm:$0xff] }
 0x123   :  { %v1928_v4 = vpop.f32.mrf.mxu2  ;;  %v1803_v26 = vadd.f32 %v4222_v45, %v1789_v42  ;;  %v1805_v12 = vadd.f32 %v4234_v16, %v1791_v0  ;;  %v1915_v20 = vadd.f32 %v1914_v62, %v1901_v13  ;;  %v3931_v45 = vld [vmem:[#allocation8 + $0x8] sm:$0xff] }
 0x124   :  { %2458 = vmatpush.bf16.msra.mxu1 %v3944_v52  ;;  %v1916_v15 = vpop.f32.mrf.mxu1 }
 0x125   :  { %v1942_v19 = vpop.f32.mrf.mxu3  ;;  %v1819_v38 = vadd.f32 %v4238_v49, %v1805_v12  ;;  %v1817_v18 = vadd.f32 %v4228_v1, %v1803_v26  ;;  %v1929_v21 = vadd.f32 %v1928_v4, %v1915_v20  ;;  %2472 = vmatpush.bf16.msra.mxu2 %v3952_v14  ;;  %v3938_v1 = vld [vmem:[#allocation8 + $0x40] sm:$0xff] }
 0x126   :  { %2445 = vmatpush.bf16.msra.mxu0 %v3935_v55  ;;  %v3947_v55 = vld [vmem:[#allocation8 + $0x88] sm:$0xff] }
 0x127   :  { %v1833_v16 = vadd.f32 %v4240_v51, %v1819_v38  ;;  %v1831_v49 = vadd.f32 %v4230_v5, %v1817_v18  ;;  %v1943_v27 = vadd.f32 %v1942_v19, %v1929_v21  ;;  %v3950_v5 = vld [vmem:[#allocation8 + $0xa0] sm:$0xff]  ;;  %v3961_v19 = vld [vmem:[#allocation8 + $0xf8] sm:$0xff]  ;;  %v3959_v21 = vld [vmem:[#allocation8 + $0xe8] sm:$0xff] }
 0x128   :  { %2459 = vmatpush.bf16.msra.mxu1 %v3943_v59  ;;  %v1902_v6 = vpop.f32.mrf.mxu0  ;;  %2485 = vmatpush.bf16.msra.mxu3 %v3961_v19 }
 0x129   :  { %v1903_v7 = vadd.f32 %v1902_v6, %v1889_v3  ;;  %v2175_v31 = vmax.f32 %v1833_v16, 0.0  ;;  %v2171_v33 = vmax.f32 %v1831_v49, 0.0  ;;  %v2172_v34 = vmax.f32 %v1943_v27, 0.0  ;;  %2473 = vmatpush.bf16.msra.mxu2 %v3951_v43  ;;  %v3957_v16 = vld [vmem:[#allocation8 + $0xd8] sm:$0xff] }
 0x12a   :  { %2446 = vmatpush.bf16.msra.mxu0 %v3934_v40  ;;  %v438_v49 = vperm.slane %v4236_v48, 3 }
 0x12b   :  { %v1917_v22 = vadd.f32 %v1916_v15, %v1903_v7  ;;  %v1930_v25 = vpop.f32.mrf.mxu2  ;;  %v2179_v51 = vpack.c.bf16 %v2175_v31, %v2171_v33  ;;  %v3960_v7 = vld [vmem:[#allocation8 + $0xf0] sm:$0xff] }
 0x12c   :  { %2460 = vmatpush.bf16.msra.mxu1 %v3942_v63  ;;  %2486 = vmatpush.bf16.msra.mxu3 %v3960_v7 }
 0x12d   :  { %v1931_v28 = vadd.f32 %v1930_v25, %v1917_v22  ;;  %v1944_v29 = vpop.f32.mrf.mxu3  ;;  %2474 = vmatpush.bf16.msra.mxu2 %v3950_v5 }
 0x12e   :  { %2447 = vmatpush.bf16.msra.mxu0 %v3933_v2 }
 0x12f   :  { %v1945_v32 = vadd.f32 %v1944_v29, %v1931_v28  ;;  %v3955_v29 = vld [vmem:[#allocation8 + $0xc8] sm:$0xff] }
 0x130   :  { %2461 = vmatpush.bf16.msra.mxu1 %v3941_v44  ;;  %2487 = vmatpush.bf16.msra.mxu3 %v3959_v21 }
 0x131   :  { %v2176_v35 = vmax.f32 %v1945_v32, 0.0  ;;  %2475 = vmatpush.bf16.msra.mxu2 %v3949_v54  ;;  %v3954_v32 = vld [vmem:[#allocation8 + $0xc0] sm:$0xff] }
 0x132   :  { %2448 = vmatpush.bf16.msra.mxu0 %v3932_v10 }
 0x133   :  { %v2180_v39 = vpack.c.bf16 %v2176_v35, %v2172_v34 }
 0x134   :  { %2462 = vmatpush.bf16.msra.mxu1 %v3940_v11 }
 0x135   :  { %2476 = vmatpush.bf16.msra.mxu2 %v3948_v47 }
 0x136   :  { %2449 = vmatpush.bf16.msra.mxu0 %v3931_v45  ;;  %v3958_v45 = vld [vmem:[#allocation8 + $0xe0] sm:$0xff] }
 0x137   :  { %2488 = vmatpush.bf16.msra.mxu3 %v3958_v45 }
 0x138   :  { %2463 = vmatpush.bf16.msra.mxu1 %v3939_v24  ;;  %v3956_v24 = vld [vmem:[#allocation8 + $0xd0] sm:$0xff] }
 0x139   :  { %2477 = vmatpush.bf16.msra.mxu2 %v3947_v55 }
 0x13a   :  { %2450 = vmatpush.bf16.msra.mxu0 %v3930_v30  ;;  %v1956_v9 = vpop.f32.mrf.mxu0 }
 0x13b   :  { %v1957_v53 = vadd.f32 %v1956_v9, %v437_v50  ;;  %2489 = vmatpush.bf16.msra.mxu3 %v3957_v16 }
 0x13c   :  { %2464 = vmatpush.bf16.msra.mxu1 %v3938_v1  ;;  %v1970_v46 = vpop.f32.mrf.mxu1 }
 0x13d   :  { %2451 = vmatmul.bf16.vlgmr.msra.gmra.mxu0 %v2179_v51  ;;  %v1971_v58 = vadd.f32 %v1970_v46, %v1957_v53  ;;  %2478 = vmatpush.bf16.msra.mxu2 %v3946_v36 }
 0x13f   :  { %2465 = vmatmul.bf16.vlgmr.msra.gmra.mxu1 %v2180_v39  ;;  %2490 = vmatpush.bf16.msra.mxu3 %v3956_v24 }
 0x142   :  { %v1958_v57 = vpop.f32.mrf.mxu0 }
 0x143   :  { %v1984_v52 = vpop.f32.mrf.mxu2  ;;  %v1959_v59 = vadd.f32 %v1958_v57, %v437_v50  ;;  %2491 = vmatpush.bf16.msra.mxu3 %v3955_v29 }
 0x144   :  { %v1998_v17 = vpop.f32.mrf.mxu3  ;;  %v1972_v56 = vpop.f32.mrf.mxu1  ;;  %v1985_v60 = vadd.f32 %v1984_v52, %v1971_v58 }
 0x145   :  { %v1973_v61 = vadd.f32 %v1972_v56, %v1959_v59 }
 0x146   :  { %v1999_v40 = vadd.f32 %v1998_v17, %v1985_v60 }
 0x147   :  { %2492 = vmatpush.bf16.msra.mxu3 %v3954_v32 }
 0x14b   :  { %v1986_v41 = vpop.f32.mrf.mxu2 }
 0x14c   :  { %v2000_v37 = vpop.f32.mrf.mxu3  ;;  %v1987_v63 = vadd.f32 %v1986_v41, %v1973_v61 }
 0x14e   :  { %v2001_v0 = vadd.f32 %v2000_v37, %v1987_v63  ;;  %v3973_v63 = vld [vmem:[%s4276_s4] ss:$0 sm:$0xff] }
 0x15a   :  { %v2012_v62 = vpop.f32.mrf.mxu0 }
 0x15b   :  { %v2013_v42 = vadd.f32 %v2012_v62, %v1999_v40 }
 0x15c   :  { %v2026_v23 = vpop.f32.mrf.mxu1 }
 0x15d   :  { %v2027_v2 = vadd.f32 %v2026_v23, %v2013_v42 }
 0x162   :  { %v2014_v3 = vpop.f32.mrf.mxu0 }
 0x163   :  { %v2040_v13 = vpop.f32.mrf.mxu2  ;;  %v2015_v4 = vadd.f32 %v2014_v3, %v2001_v0 }
 0x164   :  { %v2054_v44 = vpop.f32.mrf.mxu3  ;;  %v2028_v26 = vpop.f32.mrf.mxu1  ;;  %v2041_v12 = vadd.f32 %v2040_v13, %v2027_v2 }
 0x165   :  { %v2029_v20 = vadd.f32 %v2028_v26, %v2015_v4 }
 0x166   :  { %v2055_v8 = vadd.f32 %v2054_v44, %v2041_v12 }
 0x168   :  { %v2173_v14 = vmax.f32 %v2055_v8, 0.0 }
 0x16b   :  { %v2042_v6 = vpop.f32.mrf.mxu2 }
 0x16c   :  { %v2043_v10 = vadd.f32 %v2042_v6, %v2029_v20  ;;  %v2056_v38 = vpop.f32.mrf.mxu3 }
 0x16e   :  { %v2057_v11 = vadd.f32 %v2056_v38, %v2043_v10 }
 0x170   :  { %v2177_v15 = vmax.f32 %v2057_v11, 0.0 }
 0x172   :  { %v2181_v18 = vpack.c.bf16 %v2177_v15, %v2173_v14 }
 0x174   :  { %2479 = vmatmul.bf16.vlgmr.msra.gmra.mxu2 %v2181_v18 }
 0x17a   :  { %v2068_v22 = vpop.f32.mrf.mxu0 }
 0x17b   :  { %v2069_v30 = vadd.f32 %v2068_v22, %v438_v49 }
 0x17c   :  { %v2082_v25 = vpop.f32.mrf.mxu1 }
 0x17d   :  { %v2083_v33 = vadd.f32 %v2082_v25, %v2069_v30 }
 0x182   :  { %v2070_v31 = vpop.f32.mrf.mxu0 }
 0x183   :  { %v2096_v27 = vpop.f32.mrf.mxu2  ;;  %v2071_v34 = vadd.f32 %v2070_v31, %v438_v49 }
 0x184   :  { %v2110_v28 = vpop.f32.mrf.mxu3  ;;  %v2084_v1 = vpop.f32.mrf.mxu1  ;;  %v2097_v51 = vadd.f32 %v2096_v27, %v2083_v33 }
 0x185   :  { %v2085_v39 = vadd.f32 %v2084_v1, %v2071_v34 }
 0x186   :  { %v2111_v54 = vadd.f32 %v2110_v28, %v2097_v51 }
 0x18b   :  { %v2098_v35 = vpop.f32.mrf.mxu2 }
 0x18c   :  { %v2112_v43 = vpop.f32.mrf.mxu3  ;;  %v2099_v46 = vadd.f32 %v2098_v35, %v2085_v39 }
 0x18e   :  { %v2113_v50 = vadd.f32 %v2112_v43, %v2099_v46 }
 0x19a   :  { %v2124_v5 = vpop.f32.mrf.mxu0 }
 0x19b   :  { %v2125_v48 = vadd.f32 %v2124_v5, %v2111_v54 }
 0x19c   :  { %v2138_v9 = vpop.f32.mrf.mxu1 }
 0x19d   :  { %v2139_v17 = vadd.f32 %v2138_v9, %v2125_v48 }
 0x1a2   :  { %v2126_v53 = vpop.f32.mrf.mxu0 }
 0x1a3   :  { %v2152_v47 = vpop.f32.mrf.mxu2  ;;  %v2127_v57 = vadd.f32 %v2126_v53, %v2113_v50 }
 0x1a4   :  { %v2166_v52 = vpop.f32.mrf.mxu3  ;;  %v2153_v55 = vadd.f32 %v2152_v47, %v2139_v17  ;;  %v2140_v56 = vpop.f32.mrf.mxu1 }
 0x1a5   :  { %v2141_v58 = vadd.f32 %v2140_v56, %v2127_v57 }
 0x1a6   :  { %v2167_v59 = vadd.f32 %v2166_v52, %v2153_v55 }
 0x1a8   :  { %v2174_v37 = vmax.f32 %v2167_v59, 0.0 }
 0x1ab   :  { %v2154_v36 = vpop.f32.mrf.mxu2 }
 0x1ac   :  { %v2155_v60 = vadd.f32 %v2154_v36, %v2141_v58  ;;  %v2168_v41 = vpop.f32.mrf.mxu3 }
 0x1ae   :  { %v2169_v61 = vadd.f32 %v2168_v41, %v2155_v60 }
 0x1b0   :  { %v2178_v40 = vmax.f32 %v2169_v61, 0.0 }
 0x1b2   :  { %v2182_v62 = vpack.c.bf16 %v2178_v40, %v2174_v37 }
 0x1b4   :  { %2493 = vmatmul.bf16.vlgmr.msra.gmra.mxu3 %v2182_v62 }
 0x1ba   :  { %v2452_v23 = vpop.f32.mrf.mxu0 }
 0x1bb   :  { %v2453_v0 = vadd.f32 %v3973_v63, %v2452_v23 }
 0x1bc   :  { %v2466_v42 = vpop.f32.mrf.mxu1 }
 0x1bd   :  { %v2467_v2 = vadd.f32 %v2466_v42, %v2453_v0 }
 0x1c2   :  { %v2454_v3 = vpop.f32.mrf.mxu0 }
 0x1c3   :  { %v2455_v26 = vadd.f32 %v3973_v63, %v2454_v3 }
 0x1c4   :  { %v2468_v20 = vpop.f32.mrf.mxu1 }
 0x1c5   :  { %v2469_v19 = vadd.f32 %v2468_v20, %v2455_v26 }
 0x1f7   :  { %v2480_v13 = vpop.f32.mrf.mxu2 }
 0x1f8   :  { %v2481_v44 = vadd.f32 %v2480_v13, %v2467_v2 }
 0x1ff   :  { %v2482_v6 = vpop.f32.mrf.mxu2 }
 0x200   :  { %v2483_v8 = vadd.f32 %v2482_v6, %v2469_v19 }
 0x237   :  { %v2494_v4 = vpop.f32.mrf.mxu3 }
 0x238   :  { %v2495_v12 = vadd.f32 %v2494_v4, %v2481_v44 }
 0x23a   :  { %2499 = vst [vmem:[#allocation10] sm:$0xff] %v2495_v12 }
 0x23f   :  { %v2496_v10 = vpop.f32.mrf.mxu3 }
 0x240   :  { %v2497_v38 = vadd.f32 %v2496_v10, %v2483_v8 }
 0x242   :  { %2500 = vst [vmem:[#allocation10 + $0x8] sm:$0xff] %v2497_v38 }
 0x243   :  { %2504 = vsyncadd [#allocation4], 224  ;;  %s2507_s16 = sshll.u32 %s4277_s5, 4  ;;  %s4110_s17 = smov [#allocation10]   ;;  %s2508_s16 = int_to_ptr.hbm [resolvable:$true] %s2507_s16 }
 0x244   :  { %s2505_s18 = sshll.u32 %s4110_s17, 4  ;;  %s4111_s19 = smov 32   ;;  %s2506_s18 = int_to_ptr.vmem [resolvable:$true] %s2505_s18 }
 0x245   :  { %s4112_s20 = smov 2  }
 0x246   :  { %2513 = dma.vmem_to_hbm [thread:$0]  %s2506_s18, 32, %s2508_s16, [#allocation4], %s4111_s19, %s4111_s19, %s4112_s20  }
 0x247   :  { %4100 = dma.done.wait [#allocation4], 256  }
 0x248   :  { %4101 = vsyncadd [#allocation4], 4294967040 }
 0x249   :  { %2518 = vsyncpa [#allocation3], 1 }
 0x24a   :  { %2519 = vsyncpa [#allocation6], 1 }
 0x24b   :  { %2520 = vsyncpa [#allocation9], 1 }
 0x24c   :  { %2521 = vsyncpa [#allocation4], 1 }

</bundles_post_ra>
